<compile_context>
chip_gen: v6e
topology: v6e:2x2x1
jax: 0.10.0
libtpu: 0.0.40
codegen_flags: <defaults>
</compile_context>

<pallas_src>
import functools

import jax
import jax.numpy as jnp
from jax.experimental import pallas as pl
from jax.experimental.pallas import tpu as pltpu


def _make_kernel(m_out, wq):
    """Kernel closure over the static band geometry.

    Tap (kh, kw) of the stride-2 3x3 conv reads phase plane
        p   = 2*(kh == 1) + (kw == 1)        (row phase, col phase)
    at flat sublane offset
        off = wq*(kh == 2) + (kw == 2)
    so every tap is a contiguous (m_out, C) slice of a VMEM-resident matrix.
    """
    taps = []
    for kh in range(3):
        for kw in range(3):
            p = (2 if kh == 1 else 0) + (1 if kw == 1 else 0)
            off = (wq if kh == 2 else 0) + (1 if kw == 2 else 0)
            taps.append((p, off))

    def kernel(xp_ref, w_ref, b_ref, o_ref, acc_ref):
        # xp_ref : (1, 4, Min_pad, C)  four flattened phase bands (bf16/f32)
        # w_ref  : (9, C, C)           per-tap weights, (c_in, c_out)
        # b_ref  : (1, C)              bias (f32)
        # o_ref  : (1, m_out, C)       output rows for this band
        # acc_ref: (m_out, C) f32      accumulator scratch
        p0, off0 = taps[0]
        acc_ref[...] = jnp.dot(xp_ref[0, p0, off0:off0 + m_out, :], w_ref[0],
                               preferred_element_type=jnp.float32)
        for t in range(1, 9):
            p, off = taps[t]
            acc_ref[...] += jnp.dot(xp_ref[0, p, off:off + m_out, :], w_ref[t],
                                    preferred_element_type=jnp.float32)
        y = acc_ref[...] + b_ref[...]
        # LeakyReLU, PyTorch default negative_slope = 0.01; f32 epilogue on the VPU.
        o_ref[0] = jnp.where(y > 0.0, y, 0.01 * y).astype(o_ref.dtype)

    return kernel


def _pick_band(ho, wq, c, in_bytes, out_bytes, cap_bytes=40 << 20):
    """(rows-per-band, n_bands), sized from an explicit VMEM budget.

    The budget counts both pipeline buffers of the streamed blocks plus the
    weights/bias buffers and the f32 accumulator.  40 MiB leaves headroom on
    v7x (64 MiB physical) and is already far past the point where the ~0.35 us
    per-grid-step overhead matters, so a larger per-generation budget buys
    nothing measurable on v5e/v6e.
    """
    per_row = 2 * 4 * wq * c * in_bytes + 2 * wq * c * out_bytes + wq * c * 4
    fixed = 2 * 9 * c * c * in_bytes + 2 * 4 * wq * c * in_bytes + (2 << 20)
    trh = max(1, (cap_bytes - fixed) // per_row)
    trh = int(min(trh, ho))
    n_bands = -(-ho // trh)
    trh = -(-ho // n_bands)            # re-balance: < one padded row per band
    return trh, n_bands


@functools.partial(jax.jit, static_argnames=("compute_dtype",))
def down_conv_sample(x_nchw, weight, bias, *, compute_dtype=jnp.bfloat16):
    """x_nchw: (N, C, H, W); weight: (C, C, 3, 3); bias: (C,). Returns NCHW."""
    N, C, H, W = x_nchw.shape
    Ho = (H + 2 - 3) // 2 + 1
    Wo = (W + 2 - 3) // 2 + 1
    Wq = Wo + 1                        # +1 column halo for the kw == 2 taps
    in_b = jnp.dtype(compute_dtype).itemsize
    out_b = jnp.dtype(x_nchw.dtype).itemsize

    trh, nB = _pick_band(Ho, Wq, C, in_b, out_b)
    Ho_pad = trh * nB
    Min = (trh + 1) * Wq
    Min_pad = -(-(Min + 1) // 8) * 8   # +1 keeps the (kh,kw)=(2,2) tap slice in bounds
    Mout = trh * Wq

    # ---- wrapper layout pass: NCHW->NHWC, pad, stride-2 space-to-depth, band ----
    x_pad = jnp.pad(jnp.transpose(x_nchw, (0, 2, 3, 1)).astype(compute_dtype),
                    ((0, 0), (1, 1), (1, 1), (0, 0)))
    phases = [x_pad[:, 0::2, 0::2], x_pad[:, 0::2, 1::2],
              x_pad[:, 1::2, 0::2], x_pad[:, 1::2, 1::2]]

    def fit(p):    # crop / zero-pad each phase plane to (N, Ho_pad + 1, Wq, C)
        p = p[:, :Ho_pad + 1, :Wq]
        return jnp.pad(p, ((0, 0), (0, Ho_pad + 1 - p.shape[1]),
                           (0, Wq - p.shape[2]), (0, 0)))

    def band(p):   # (N, Ho_pad+1, Wq, C) -> (N, nB, trh+1, Wq, C), one-row halo/band
        main = p[:, :Ho_pad].reshape(N, nB, trh, Wq, C)
        halo = p[:, trh::trh][:, :, None]
        return jnp.concatenate([main, halo], axis=2)

    xp = jnp.stack([band(fit(p)) for p in phases], axis=2)  # (N, nB, 4, trh+1, Wq, C)
    xp = xp.reshape(N * nB, 4, Min, C)
    xp = jnp.pad(xp, ((0, 0), (0, 0), (0, Min_pad - Min), (0, 0)))

    # (C_out, C_in, kh, kw) -> (9, C_in, C_out), tap index t = kh*3 + kw.
    w9 = jnp.transpose(weight, (2, 3, 1, 0)).reshape(9, C, C).astype(compute_dtype)
    b2d = bias.reshape(1, C).astype(jnp.float32)

    # ---- VMEM accounting: every double-buffered block + scratch + slack ----
    need = (2 * 4 * Min_pad * C * in_b + 2 * Mout * C * out_b + Mout * C * 4
            + 2 * 9 * C * C * in_b + 2 * C * 4 + (4 << 20))
    vmem_limit = int(min(max(need, 16 << 20), 64 << 20))

    cost = pl.CostEstimate(
        flops=2 * N * Ho * Wo * 9 * C * C,
        transcendentals=0,
        bytes_accessed=int(xp.size * in_b + 9 * C * C * in_b + C * 4
                           + N * nB * Mout * C * out_b))

    out_flat = pl.pallas_call(
        _make_kernel(Mout, Wq),
        out_shape=jax.ShapeDtypeStruct((N * nB, Mout, C), x_nchw.dtype),
        grid_spec=pltpu.PrefetchScalarGridSpec(
            num_scalar_prefetch=0,
            grid=(N * nB,),            # single flattened batch x row-band axis
            in_specs=[
                pl.BlockSpec((1, 4, Min_pad, C), lambda g: (g, 0, 0, 0)),
                pl.BlockSpec((9, C, C), lambda g: (0, 0, 0)),
                pl.BlockSpec((1, C), lambda g: (0, 0)),
            ],
            out_specs=pl.BlockSpec((1, Mout, C), lambda g: (g, 0, 0)),
            scratch_shapes=[pltpu.VMEM((Mout, C), jnp.float32)],
        ),
        compiler_params=pltpu.CompilerParams(
            dimension_semantics=("parallel",),
            vmem_limit_bytes=vmem_limit),
        cost_estimate=cost,
    )(xp, w9, b2d)

    # Drop the halo column / padded rows and restore NCHW: one fused pass over the
    # 4x-smaller output.  TODO(synk): return NHWC here if the consumer accepts it.
    out = out_flat.reshape(N, nB, trh, Wq, C)[:, :, :, :Wo, :]
    out = out.reshape(N, Ho_pad, Wo, C)[:, :Ho]
    return jnp.transpose(out, (0, 3, 1, 2))


def _reference(x_nchw, weight, bias):
    y = jax.lax.conv_general_dilated(
        x_nchw, weight, window_strides=(2, 2), padding=((1, 1), (1, 1)),
        dimension_numbers=("NCHW", "OIHW", "NCHW"))
    y = y + bias.reshape(1, -1, 1, 1)
    return jnp.where(y > 0, y, 0.01 * y)


if __name__ == "__main__":
    key = jax.random.PRNGKey(0)
    kx, kw_, kb = jax.random.split(key, 3)

    N, C, H, W = 2, 4, 16, 16
    x = jax.random.normal(kx, (N, C, H, W), dtype=jnp.float32)

    # Deterministic parameter init mimicking nn.Conv2d defaults.
    fan_in = C * 3 * 3
    bound = 1.0 / jnp.sqrt(jnp.float32(fan_in))
    weight = jax.random.uniform(kw_, (C, C, 3, 3), jnp.float32, -bound, bound)
    bias = jax.random.uniform(kb, (C,), jnp.float32, -bound, bound)

    ref = _reference(x, weight, bias)

    # Default (perf) path: bf16 MXU operands, f32 accumulate / epilogue.
    out = jax.block_until_ready(down_conv_sample(x, weight, bias))
    assert out.shape == (N, C, H // 2, W // 2), out.shape
    assert jnp.allclose(out, ref, atol=5e-2, rtol=5e-2), \
        float(jnp.max(jnp.abs(out - ref)))

    # Full-precision path: confirms the phase-decomposed tap/GEMM restructuring
    # is numerically exact.
    out_f32 = jax.block_until_ready(
        down_conv_sample(x, weight, bias, compute_dtype=jnp.float32))
    assert jnp.allclose(out_f32, ref, atol=1e-4, rtol=1e-4), \
        float(jnp.max(jnp.abs(out_f32 - ref)))

    print("KERNEL_OK")
</pallas_src>

<mosaic_0001>
module attributes {stable_mosaic.version = 11 : i64} {
  func.func @kernel(%arg0: i32, %arg1: memref<1x4x88x4xbf16, #tpu.memory_space<vmem>>, %arg2: memref<9x4x4xbf16, #tpu.memory_space<vmem>>, %arg3: memref<1x4xf32, #tpu.memory_space<vmem>>, %arg4: memref<1x72x4xf32, #tpu.memory_space<vmem>>, %arg5: memref<72x4xf32, #tpu.memory_space<vmem>>) attributes {dimension_semantics = [#tpu.dimension_semantics<parallel>], iteration_bounds = array<i64: 2>, scalar_prefetch = 0 : i64, scratch_operands = 1 : i64, tpu.core_type = #tpu.core_type<tc>, window_params = [{transform_indices = @transform_0, window_bounds = array<i64: 1, 4, 88, 4>}, {pipeline_mode = #tpu.pipeline_mode<synchronous>, transform_indices = @transform_1, window_bounds = array<i64: 9, 4, 4>}, {pipeline_mode = #tpu.pipeline_mode<synchronous>, transform_indices = @transform_2, window_bounds = array<i64: 1, 4>}, {transform_indices = @transform_3, window_bounds = array<i64: 1, 72, 4>}]} {
    %c0 = arith.constant 0 : index
    %c0_0 = arith.constant 0 : index
    %c0_1 = arith.constant 0 : index
    %c0_2 = arith.constant 0 : index
    %0 = vector.load %arg1[%c0, %c0_0, %c0_1, %c0_2] : memref<1x4x88x4xbf16, #tpu.memory_space<vmem>>, vector<1x1x72x4xbf16>
    %1 = vector.shape_cast %0 : vector<1x1x72x4xbf16> to vector<72x4xbf16>
    %c0_3 = arith.constant 0 : index
    %c0_4 = arith.constant 0 : index
    %c0_5 = arith.constant 0 : index
    %2 = vector.load %arg2[%c0_3, %c0_4, %c0_5] : memref<9x4x4xbf16, #tpu.memory_space<vmem>>, vector<1x4x4xbf16>
    %3 = vector.shape_cast %2 : vector<1x4x4xbf16> to vector<4x4xbf16>
    %cst = arith.constant dense<0.000000e+00> : vector<72x4xf32>
    %4 = tpu.matmul %1, %3, %cst {dimension_numbers = #tpu.dot_dimension_numbers<[1], [0], [0], [1], [0, 0, 1, 1], [], []>} : vector<72x4xbf16>, vector<4x4xbf16>, vector<72x4xf32> -> vector<72x4xf32>
    %c0_6 = arith.constant 0 : index
    %c0_7 = arith.constant 0 : index
    %5 = vector.load %arg5[%c0_6, %c0_7] : memref<72x4xf32, #tpu.memory_space<vmem>>, vector<72x4xf32>
    tpu.vector_store %arg5[%c0_6, %c0_7], %4 {strides = array<i32>} : memref<72x4xf32, #tpu.memory_space<vmem>>, vector<72x4xf32>,
    %c0_8 = arith.constant 0 : index
    %c0_9 = arith.constant 0 : index
    %6 = vector.load %arg5[%c0_8, %c0_9] : memref<72x4xf32, #tpu.memory_space<vmem>>, vector<72x4xf32>
    %c0_10 = arith.constant 0 : index
    %c1 = arith.constant 1 : index
    %c0_11 = arith.constant 0 : index
    %c0_12 = arith.constant 0 : index
    %7 = vector.load %arg1[%c0_10, %c1, %c0_11, %c0_12] : memref<1x4x88x4xbf16, #tpu.memory_space<vmem>>, vector<1x1x72x4xbf16>
    %8 = vector.shape_cast %7 : vector<1x1x72x4xbf16> to vector<72x4xbf16>
    %c1_13 = arith.constant 1 : index
    %c0_14 = arith.constant 0 : index
    %c0_15 = arith.constant 0 : index
    %9 = vector.load %arg2[%c1_13, %c0_14, %c0_15] : memref<9x4x4xbf16, #tpu.memory_space<vmem>>, vector<1x4x4xbf16>
    %10 = vector.shape_cast %9 : vector<1x4x4xbf16> to vector<4x4xbf16>
    %cst_16 = arith.constant dense<0.000000e+00> : vector<72x4xf32>
    %11 = tpu.matmul %8, %10, %cst_16 {dimension_numbers = #tpu.dot_dimension_numbers<[1], [0], [0], [1], [0, 0, 1, 1], [], []>} : vector<72x4xbf16>, vector<4x4xbf16>, vector<72x4xf32> -> vector<72x4xf32>
    %12 = arith.addf %6, %11 : vector<72x4xf32>
    %c0_17 = arith.constant 0 : index
    %c0_18 = arith.constant 0 : index
    %13 = vector.load %arg5[%c0_17, %c0_18] : memref<72x4xf32, #tpu.memory_space<vmem>>, vector<72x4xf32>
    tpu.vector_store %arg5[%c0_17, %c0_18], %12 {strides = array<i32>} : memref<72x4xf32, #tpu.memory_space<vmem>>, vector<72x4xf32>,
    %c0_19 = arith.constant 0 : index
    %c0_20 = arith.constant 0 : index
    %14 = vector.load %arg5[%c0_19, %c0_20] : memref<72x4xf32, #tpu.memory_space<vmem>>, vector<72x4xf32>
    %c0_21 = arith.constant 0 : index
    %c0_22 = arith.constant 0 : index
    %c1_23 = arith.constant 1 : index
    %c0_24 = arith.constant 0 : index
    %15 = vector.load %arg1[%c0_21, %c0_22, %c1_23, %c0_24] : memref<1x4x88x4xbf16, #tpu.memory_space<vmem>>, vector<1x1x72x4xbf16>
    %16 = vector.shape_cast %15 : vector<1x1x72x4xbf16> to vector<72x4xbf16>
    %c2 = arith.constant 2 : index
    %c0_25 = arith.constant 0 : index
    %c0_26 = arith.constant 0 : index
    %17 = vector.load %arg2[%c2, %c0_25, %c0_26] : memref<9x4x4xbf16, #tpu.memory_space<vmem>>, vector<1x4x4xbf16>
    %18 = vector.shape_cast %17 : vector<1x4x4xbf16> to vector<4x4xbf16>
    %cst_27 = arith.constant dense<0.000000e+00> : vector<72x4xf32>
    %19 = tpu.matmul %16, %18, %cst_27 {dimension_numbers = #tpu.dot_dimension_numbers<[1], [0], [0], [1], [0, 0, 1, 1], [], []>} : vector<72x4xbf16>, vector<4x4xbf16>, vector<72x4xf32> -> vector<72x4xf32>
    %20 = arith.addf %14, %19 : vector<72x4xf32>
    %c0_28 = arith.constant 0 : index
    %c0_29 = arith.constant 0 : index
    %21 = vector.load %arg5[%c0_28, %c0_29] : memref<72x4xf32, #tpu.memory_space<vmem>>, vector<72x4xf32>
    tpu.vector_store %arg5[%c0_28, %c0_29], %20 {strides = array<i32>} : memref<72x4xf32, #tpu.memory_space<vmem>>, vector<72x4xf32>,
    %c0_30 = arith.constant 0 : index
    %c0_31 = arith.constant 0 : index
    %22 = vector.load %arg5[%c0_30, %c0_31] : memref<72x4xf32, #tpu.memory_space<vmem>>, vector<72x4xf32>
    %c0_32 = arith.constant 0 : index
    %c2_33 = arith.constant 2 : index
    %c0_34 = arith.constant 0 : index
    %c0_35 = arith.constant 0 : index
    %23 = vector.load %arg1[%c0_32, %c2_33, %c0_34, %c0_35] : memref<1x4x88x4xbf16, #tpu.memory_space<vmem>>, vector<1x1x72x4xbf16>
    %24 = vector.shape_cast %23 : vector<1x1x72x4xbf16> to vector<72x4xbf16>
    %c3 = arith.constant 3 : index
    %c0_36 = arith.constant 0 : index
    %c0_37 = arith.constant 0 : index
    %25 = vector.load %arg2[%c3, %c0_36, %c0_37] : memref<9x4x4xbf16, #tpu.memory_space<vmem>>, vector<1x4x4xbf16>
    %26 = vector.shape_cast %25 : vector<1x4x4xbf16> to vector<4x4xbf16>
    %cst_38 = arith.constant dense<0.000000e+00> : vector<72x4xf32>
    %27 = tpu.matmul %24, %26, %cst_38 {dimension_numbers = #tpu.dot_dimension_numbers<[1], [0], [0], [1], [0, 0, 1, 1], [], []>} : vector<72x4xbf16>, vector<4x4xbf16>, vector<72x4xf32> -> vector<72x4xf32>
    %28 = arith.addf %22, %27 : vector<72x4xf32>
    %c0_39 = arith.constant 0 : index
    %c0_40 = arith.constant 0 : index
    %29 = vector.load %arg5[%c0_39, %c0_40] : memref<72x4xf32, #tpu.memory_space<vmem>>, vector<72x4xf32>
    tpu.vector_store %arg5[%c0_39, %c0_40], %28 {strides = array<i32>} : memref<72x4xf32, #tpu.memory_space<vmem>>, vector<72x4xf32>,
    %c0_41 = arith.constant 0 : index
    %c0_42 = arith.constant 0 : index
    %30 = vector.load %arg5[%c0_41, %c0_42] : memref<72x4xf32, #tpu.memory_space<vmem>>, vector<72x4xf32>
    %c0_43 = arith.constant 0 : index
    %c3_44 = arith.constant 3 : index
    %c0_45 = arith.constant 0 : index
    %c0_46 = arith.constant 0 : index
    %31 = vector.load %arg1[%c0_43, %c3_44, %c0_45, %c0_46] : memref<1x4x88x4xbf16, #tpu.memory_space<vmem>>, vector<1x1x72x4xbf16>
    %32 = vector.shape_cast %31 : vector<1x1x72x4xbf16> to vector<72x4xbf16>
    %c4 = arith.constant 4 : index
    %c0_47 = arith.constant 0 : index
    %c0_48 = arith.constant 0 : index
    %33 = vector.load %arg2[%c4, %c0_47, %c0_48] : memref<9x4x4xbf16, #tpu.memory_space<vmem>>, vector<1x4x4xbf16>
    %34 = vector.shape_cast %33 : vector<1x4x4xbf16> to vector<4x4xbf16>
    %cst_49 = arith.constant dense<0.000000e+00> : vector<72x4xf32>
    %35 = tpu.matmul %32, %34, %cst_49 {dimension_numbers = #tpu.dot_dimension_numbers<[1], [0], [0], [1], [0, 0, 1, 1], [], []>} : vector<72x4xbf16>, vector<4x4xbf16>, vector<72x4xf32> -> vector<72x4xf32>
    %36 = arith.addf %30, %35 : vector<72x4xf32>
    %c0_50 = arith.constant 0 : index
    %c0_51 = arith.constant 0 : index
    %37 = vector.load %arg5[%c0_50, %c0_51] : memref<72x4xf32, #tpu.memory_space<vmem>>, vector<72x4xf32>
    tpu.vector_store %arg5[%c0_50, %c0_51], %36 {strides = array<i32>} : memref<72x4xf32, #tpu.memory_space<vmem>>, vector<72x4xf32>,
    %c0_52 = arith.constant 0 : index
    %c0_53 = arith.constant 0 : index
    %38 = vector.load %arg5[%c0_52, %c0_53] : memref<72x4xf32, #tpu.memory_space<vmem>>, vector<72x4xf32>
    %c0_54 = arith.constant 0 : index
    %c2_55 = arith.constant 2 : index
    %c1_56 = arith.constant 1 : index
    %c0_57 = arith.constant 0 : index
    %39 = vector.load %arg1[%c0_54, %c2_55, %c1_56, %c0_57] : memref<1x4x88x4xbf16, #tpu.memory_space<vmem>>, vector<1x1x72x4xbf16>
    %40 = vector.shape_cast %39 : vector<1x1x72x4xbf16> to vector<72x4xbf16>
    %c5 = arith.constant 5 : index
    %c0_58 = arith.constant 0 : index
    %c0_59 = arith.constant 0 : index
    %41 = vector.load %arg2[%c5, %c0_58, %c0_59] : memref<9x4x4xbf16, #tpu.memory_space<vmem>>, vector<1x4x4xbf16>
    %42 = vector.shape_cast %41 : vector<1x4x4xbf16> to vector<4x4xbf16>
    %cst_60 = arith.constant dense<0.000000e+00> : vector<72x4xf32>
    %43 = tpu.matmul %40, %42, %cst_60 {dimension_numbers = #tpu.dot_dimension_numbers<[1], [0], [0], [1], [0, 0, 1, 1], [], []>} : vector<72x4xbf16>, vector<4x4xbf16>, vector<72x4xf32> -> vector<72x4xf32>
    %44 = arith.addf %38, %43 : vector<72x4xf32>
    %c0_61 = arith.constant 0 : index
    %c0_62 = arith.constant 0 : index
    %45 = vector.load %arg5[%c0_61, %c0_62] : memref<72x4xf32, #tpu.memory_space<vmem>>, vector<72x4xf32>
    tpu.vector_store %arg5[%c0_61, %c0_62], %44 {strides = array<i32>} : memref<72x4xf32, #tpu.memory_space<vmem>>, vector<72x4xf32>,
    %c0_63 = arith.constant 0 : index
    %c0_64 = arith.constant 0 : index
    %46 = vector.load %arg5[%c0_63, %c0_64] : memref<72x4xf32, #tpu.memory_space<vmem>>, vector<72x4xf32>
    %c0_65 = arith.constant 0 : index
    %c0_66 = arith.constant 0 : index
    %c9 = arith.constant 9 : index
    %c0_67 = arith.constant 0 : index
    %47 = vector.load %arg1[%c0_65, %c0_66, %c9, %c0_67] : memref<1x4x88x4xbf16, #tpu.memory_space<vmem>>, vector<1x1x72x4xbf16>
    %48 = vector.shape_cast %47 : vector<1x1x72x4xbf16> to vector<72x4xbf16>
    %c6 = arith.constant 6 : index
    %c0_68 = arith.constant 0 : index
    %c0_69 = arith.constant 0 : index
    %49 = vector.load %arg2[%c6, %c0_68, %c0_69] : memref<9x4x4xbf16, #tpu.memory_space<vmem>>, vector<1x4x4xbf16>
    %50 = vector.shape_cast %49 : vector<1x4x4xbf16> to vector<4x4xbf16>
    %cst_70 = arith.constant dense<0.000000e+00> : vector<72x4xf32>
    %51 = tpu.matmul %48, %50, %cst_70 {dimension_numbers = #tpu.dot_dimension_numbers<[1], [0], [0], [1], [0, 0, 1, 1], [], []>} : vector<72x4xbf16>, vector<4x4xbf16>, vector<72x4xf32> -> vector<72x4xf32>
    %52 = arith.addf %46, %51 : vector<72x4xf32>
    %c0_71 = arith.constant 0 : index
    %c0_72 = arith.constant 0 : index
    %53 = vector.load %arg5[%c0_71, %c0_72] : memref<72x4xf32, #tpu.memory_space<vmem>>, vector<72x4xf32>
    tpu.vector_store %arg5[%c0_71, %c0_72], %52 {strides = array<i32>} : memref<72x4xf32, #tpu.memory_space<vmem>>, vector<72x4xf32>,
    %c0_73 = arith.constant 0 : index
    %c0_74 = arith.constant 0 : index
    %54 = vector.load %arg5[%c0_73, %c0_74] : memref<72x4xf32, #tpu.memory_space<vmem>>, vector<72x4xf32>
    %c0_75 = arith.constant 0 : index
    %c1_76 = arith.constant 1 : index
    %c9_77 = arith.constant 9 : index
    %c0_78 = arith.constant 0 : index
    %55 = vector.load %arg1[%c0_75, %c1_76, %c9_77, %c0_78] : memref<1x4x88x4xbf16, #tpu.memory_space<vmem>>, vector<1x1x72x4xbf16>
    %56 = vector.shape_cast %55 : vector<1x1x72x4xbf16> to vector<72x4xbf16>
    %c7 = arith.constant 7 : index
    %c0_79 = arith.constant 0 : index
    %c0_80 = arith.constant 0 : index
    %57 = vector.load %arg2[%c7, %c0_79, %c0_80] : memref<9x4x4xbf16, #tpu.memory_space<vmem>>, vector<1x4x4xbf16>
    %58 = vector.shape_cast %57 : vector<1x4x4xbf16> to vector<4x4xbf16>
    %cst_81 = arith.constant dense<0.000000e+00> : vector<72x4xf32>
    %59 = tpu.matmul %56, %58, %cst_81 {dimension_numbers = #tpu.dot_dimension_numbers<[1], [0], [0], [1], [0, 0, 1, 1], [], []>} : vector<72x4xbf16>, vector<4x4xbf16>, vector<72x4xf32> -> vector<72x4xf32>
    %60 = arith.addf %54, %59 : vector<72x4xf32>
    %c0_82 = arith.constant 0 : index
    %c0_83 = arith.constant 0 : index
    %61 = vector.load %arg5[%c0_82, %c0_83] : memref<72x4xf32, #tpu.memory_space<vmem>>, vector<72x4xf32>
    tpu.vector_store %arg5[%c0_82, %c0_83], %60 {strides = array<i32>} : memref<72x4xf32, #tpu.memory_space<vmem>>, vector<72x4xf32>,
    %c0_84 = arith.constant 0 : index
    %c0_85 = arith.constant 0 : index
    %62 = vector.load %arg5[%c0_84, %c0_85] : memref<72x4xf32, #tpu.memory_space<vmem>>, vector<72x4xf32>
    %c0_86 = arith.constant 0 : index
    %c0_87 = arith.constant 0 : index
    %c10 = arith.constant 10 : index
    %c0_88 = arith.constant 0 : index
    %63 = vector.load %arg1[%c0_86, %c0_87, %c10, %c0_88] : memref<1x4x88x4xbf16, #tpu.memory_space<vmem>>, vector<1x1x72x4xbf16>
    %64 = vector.shape_cast %63 : vector<1x1x72x4xbf16> to vector<72x4xbf16>
    %c8 = arith.constant 8 : index
    %c0_89 = arith.constant 0 : index
    %c0_90 = arith.constant 0 : index
    %65 = vector.load %arg2[%c8, %c0_89, %c0_90] : memref<9x4x4xbf16, #tpu.memory_space<vmem>>, vector<1x4x4xbf16>
    %66 = vector.shape_cast %65 : vector<1x4x4xbf16> to vector<4x4xbf16>
    %cst_91 = arith.constant dense<0.000000e+00> : vector<72x4xf32>
    %67 = tpu.matmul %64, %66, %cst_91 {dimension_numbers = #tpu.dot_dimension_numbers<[1], [0], [0], [1], [0, 0, 1, 1], [], []>} : vector<72x4xbf16>, vector<4x4xbf16>, vector<72x4xf32> -> vector<72x4xf32>
    %68 = arith.addf %62, %67 : vector<72x4xf32>
    %c0_92 = arith.constant 0 : index
    %c0_93 = arith.constant 0 : index
    %69 = vector.load %arg5[%c0_92, %c0_93] : memref<72x4xf32, #tpu.memory_space<vmem>>, vector<72x4xf32>
    tpu.vector_store %arg5[%c0_92, %c0_93], %68 {strides = array<i32>} : memref<72x4xf32, #tpu.memory_space<vmem>>, vector<72x4xf32>,
    %c0_94 = arith.constant 0 : index
    %c0_95 = arith.constant 0 : index
    %70 = vector.load %arg5[%c0_94, %c0_95] : memref<72x4xf32, #tpu.memory_space<vmem>>, vector<72x4xf32>
    %c0_96 = arith.constant 0 : index
    %c0_97 = arith.constant 0 : index
    %71 = vector.load %arg3[%c0_96, %c0_97] : memref<1x4xf32, #tpu.memory_space<vmem>>, vector<1x4xf32>
    %72 = vector.broadcast %71 : vector<1x4xf32> to vector<72x4xf32>
    %73 = arith.addf %70, %72 : vector<72x4xf32>
    %cst_98 = arith.constant 0.000000e+00 : f32
    %74 = vector.broadcast %cst_98 : f32 to vector<72x4xf32>
    %75 = arith.cmpf ogt, %73, %74 : vector<72x4xf32>
    %cst_99 = arith.constant 0.00999999977 : f32
    %76 = vector.broadcast %cst_99 : f32 to vector<72x4xf32>
    %77 = arith.mulf %76, %73 : vector<72x4xf32>
    %78 = arith.select %75, %73, %77 : vector<72x4xi1>, vector<72x4xf32>
    %c0_100 = arith.constant 0 : index
    %c0_101 = arith.constant 0 : index
    %c0_102 = arith.constant 0 : index
    %79 = vector.load %arg4[%c0_100, %c0_101, %c0_102] : memref<1x72x4xf32, #tpu.memory_space<vmem>>, vector<1x72x4xf32>
    %80 = vector.shape_cast %79 : vector<1x72x4xf32> to vector<72x4xf32>
    %81 = vector.shape_cast %78 : vector<72x4xf32> to vector<1x72x4xf32>
    tpu.vector_store %arg4[%c0_100, %c0_101, %c0_102], %81 {strides = array<i32>} : memref<1x72x4xf32, #tpu.memory_space<vmem>>, vector<1x72x4xf32>,
    return
  }
  func.func @transform_0(%arg0: i32) -> (i32, i32, i32, i32) {
    %c0_i32 = arith.constant 0 : i32
    %c0_i32_0 = arith.constant 0 : i32
    %c0_i32_1 = arith.constant 0 : i32
    %c0_i32_2 = arith.constant 0 : i32
    return %arg0, %c0_i32, %c0_i32_0, %c0_i32_1 : i32, i32, i32, i32
  }
  func.func @transform_1(%arg0: i32) -> (i32, i32, i32) {
    %c0_i32 = arith.constant 0 : i32
    %c0_i32_0 = arith.constant 0 : i32
    %c0_i32_1 = arith.constant 0 : i32
    %c0_i32_2 = arith.constant 0 : i32
    return %c0_i32, %c0_i32_0, %c0_i32_1 : i32, i32, i32
  }
  func.func @transform_2(%arg0: i32) -> (i32, i32) {
    %c0_i32 = arith.constant 0 : i32
    %c0_i32_0 = arith.constant 0 : i32
    %c0_i32_1 = arith.constant 0 : i32
    return %c0_i32, %c0_i32_0 : i32, i32
  }
  func.func @transform_3(%arg0: i32) -> (i32, i32, i32) {
    %c0_i32 = arith.constant 0 : i32
    %c0_i32_0 = arith.constant 0 : i32
    %c0_i32_1 = arith.constant 0 : i32
    return %arg0, %c0_i32, %c0_i32_0 : i32, i32, i32
  }
}

</mosaic_0001>

<bundles_post_ra>
// kernel: down_conv_sample.1
= control target key start
LH: loop header
LB: loop body
LE: loop exit
PB: predicated region body
PF: predicated region fallthrough
CT: control target
= control target key end

     0   :  { %s2311_s12 = smov 0   ;;  %s2771_s0 = inlined_call_operand.vmem [shape: bf16[2,4,88,4], index: 0, kind: input, shape index: {}]   ;;  %s2772_s1 = inlined_call_operand.vmem [shape: bf16[9,4,4], index: 1, kind: input, shape index: {}]   ;;  %s2773_s2 = inlined_call_operand.vmem [shape: f32[1,4], index: 2, kind: input, shape index: {}]   ;;  %s2774_s3 = inlined_call_operand.vmem [shape: f32[2,72,4], index: 3, kind: output, shape index: {}]  }
   0x1 LB: > { %s1815_s13 = sadd.s32 4294967295, %s2287_s12   ;;  %p1819_p0 = scmp.ge.s32.totalorder %s2287_s12, 1  ;;  %s2287_s12 = sphi %s2311_s12, %s13_s12  }
   0x2   : > { %p137_p1 = scmp.lt.s32.totalorder %s2287_s12, 3 }
   0x4   : > { %p138_p2 = pnand %p1819_p0, %p137_p1 }
   0x5   : > { %p161_p3 = scmp.lt.s32.totalorder (!%p138_p2), %s1815_s13, 1 }
   0x6   : > { %141 = sbr.rel (%p138_p2) target bundleno = 403 (0x193), region = 32 }
   0xb   : > { %v181_v0 = vld [vmem:[%s2772_s1] sm:$0x3]  ;;  %vm221_vm0 = vcmask 1041408   ;;  %v2289_v1 = vmov 0.0   ;;  %s2776_s13 = smov (!%p161_p3, %s1815_s13), 1  ;;  %vm2290_vm1 = vmmov 0  }
   0xc   : > { %2222 = vmatprep.subr.bf16.mxu1 %v2289_v1  ;;  %2024 = vmatprep.subr.bf16.mxu0 %v2289_v1  ;;  %v223_v2 = vsel %vm221_vm0, %v181_v0, 0  ;;  %s2224_s16 = smul.u32 176, %s2776_s13  ;;  %v1852_v3 = vld [vmem:[%s2772_s1 + $0x4] sm:$0x3]  ;;  %v1841_v4 = vld [vmem:[%s2772_s1 + $0x2] sm:$0x3] }
   0xd   : > { %2223 = vmatpush3.bf16.msra.mxu1 %v223_v2  ;;  %2025 = vmatpush3.bf16.msra.mxu0 %v223_v2  ;;  %vm205_vm2 = vcmask 31744   ;;  %v560_v6 = vsel %vm221_vm0, %v1852_v3, 0  ;;  %v366_v8 = vsel %vm221_vm0, %v1841_v4, 0  ;;  %v1872_v14 = vld [vmem:[%s2772_s1 + $0x6] sm:$0x3]  ;;  %vm1581_vm4 = vcmask 1046528  }
   0xe   : > { %2026 = vmatprep.mubr.msk.bf16.mxu0 %vm2290_vm1, %v2289_v1  ;;  %2038 = vmatprep.mubr.msk.bf16.mxu1 %vm2290_vm1, %v2289_v1  ;;  %s2343_s23 = scalar_lea.vmem %s2771_s0, %s2224_s16  ;;  %vm504_vm3 = vsmask.f32 7424  ;;  %v712_v21 = vsel %vm221_vm0, %v1872_v14, 0  ;;  %v1892_v25 = vld [vmem:[%s2772_s1 + $0x8] sm:$0x3]  ;;  %s2225_s11 = smul.u32 72, %s2776_s13 }
   0xf   : > { %2046 = vmatprep.subr.bf16.mxu1 %v2289_v1  ;;  %2068 = vmatprep.subr.bf16.mxu0 %v2289_v1  ;;  %v2236_v5 = vld [vmem:[%s2343_s23] sm:$0xff]   ;;  %v2237_v7 = vld [vmem:[%s2343_s23 + $0x18] sm:$0xff]   ;;  %v2238_v9 = vld [vmem:[%s2343_s23 + $0x8] sm:$0xff]   ;;  %v864_v32 = vsel %vm221_vm0, %v1892_v25, 0 }
  0x10   : > { %2027 = vmatmul.mubr.msk.bf16.vlgmr.msra.gmra.mxu0 %vm205_vm2, %v2236_v5  ;;  %2039 = vmatmul.mubr.msk.bf16.vlgmr.msra.gmra.mxu1 %vm205_vm2, %v2237_v7  ;;  %v2239_v10 = vld [vmem:[%s2343_s23 + $0x20] ss:$0 sps:$4 sm:$0xff]   ;;  %v2244_v12 = vld [vmem:[%s2343_s23 + $0x8] sm:$0xff]   ;;  %v2240_v15 = vld [vmem:[%s2343_s23 + $0x10] sm:$0xff]   ;;  %s2730_s16 = scalar_lea.vmem %s2774_s3, %s2225_s11 }
  0x11   : > { %2069 = vmatpush3.bf16.msra.mxu0 %v560_v6  ;;  %2047 = vmatpush3.bf16.msra.mxu1 %v366_v8  ;;  %v2243_v11 = vld [vmem:[%s2343_s23] sm:$0xff]   ;;  %v2241_v16 = vld [vmem:[%s2343_s23 + $0x2c] sm:$0xff]   ;;  %v513_v19 = vshll.u32 %v2244_v12, 16  ;;  %v2375_v22 = vld [vmem:[%s2343_s23 + $0x18] sm:$0xff]   ;;  %v517_v28 = vshrl.u32 %v2244_v12, 16 }
  0x12   : > { %2030 = vmatprep.mubr.msk.bf16.mxu0 %vm2290_vm1, %v2289_v1  ;;  %2042 = vmatprep.mubr.msk.bf16.mxu1 %vm2290_vm1, %v2289_v1  ;;  %v508_v13 = vshll.u32 %v2243_v11, 16  ;;  %v506_v17 = vshrl.u32 %v2243_v11, 16  ;;  %v2246_v20 = vld [vmem:[%s2343_s23 + $0x10] sm:$0xff]   ;;  %v529_v29 = vshll.u32 %v2375_v22, 16  ;;  %v2391_v31 = vld [vmem:[%s2343_s23 + $0x20] sm:$0x1f]  }
  0x13   : > { %2090 = vmatprep.subr.bf16.mxu1 %v2289_v1  ;;  %2112 = vmatprep.subr.bf16.mxu0 %v2289_v1  ;;  %v515_v24 = vrot.slane %v513_v19, 1  ;;  %v521_v26 = vshll.u32 %v2246_v20, 16  ;;  %v2242_v27 = vld [vmem:[%s2343_s23 + $0x34] sm:$0xff]   ;;  %v525_v34 = vshrl.u32 %v2246_v20, 16  ;;  %v533_v37 = vshrl.u32 %v2375_v22, 16  ;;  %v2262_v39 = vld [vmem:[%s2343_s23 + $0x60] sm:$0xff]  }
  0x14   : > { %v510_v18 = vrot.slane %v508_v13, 1  ;;  %v2395_v36 = vrot.slane %v529_v29, 1  ;;  %v2261_v38 = vld [vmem:[%s2343_s23 + $0x58] sm:$0xff]   ;;  %v537_v40 = vshll.u32 %v2391_v31, 16  ;;  %v2263_v41 = vld [vmem:[%s2343_s23 + $0x68] sm:$0xff]   ;;  %v1010_v44 = vshll.u32 %v2262_v39, 16 }
  0x15   : > { %v523_v33 = vrot.slane %v521_v26, 1  ;;  %v519_v35 = vor.u32 %v517_v28, %v515_v24  ;;  %v1003_v42 = vshrl.u32 %v2261_v38, 16  ;;  %v1005_v43 = vshll.u32 %v2261_v38, 16  ;;  %v2245_v46 = vld [vmem:[%s2343_s23 + $0x3c] sm:$0xff]   ;;  %v2264_v48 = vld [vmem:[%s2343_s23 + $0x4] sm:$0xff]   ;;  %v2265_v53 = vld [vmem:[%s2343_s23 + $0xc] sm:$0xff]  }
  0x16   : > { %v511_v23 = vor.u32 %v510_v18, %v506_v17  ;;  %v1014_v45 = vshrl.u32 %v2262_v39, 16  ;;  %v1018_v47 = vshll.u32 %v2263_v41, 16  ;;  %v1012_v52 = vrot.slane %v1010_v44, 1  ;;  %v2266_v54 = vld [vmem:[%s2343_s23 + $0x70] sm:$0xff]   ;;  %v2425_v11 = vld [vmem:[%s2343_s23 + $0x78] sm:$0x1f]  }
  0x17   : > { %v524_v49 = vsel %vm504_vm3, %v519_v35, %v523_v33  ;;  %v527_v50 = vor.u32 %v525_v34, %v523_v33  ;;  %v1007_v51 = vrot.slane %v1005_v43, 1  ;;  %v1196_v56 = vshrl.u32 %v2264_v48, 16  ;;  %v2267_v2 = vld [vmem:[%s2343_s23 + $0x14] sm:$0xff]   ;;  %v2269_v12 = vld [vmem:[%s2343_s23 + $0x1c] sm:$0xff]   ;;  %v2247_v18 = vld [vmem:[%s2343_s23 + $0x44] sm:$0xff]  }
  0x18   : > { %2031 = vmatmul.mubr.msk.bf16.gmra.mxu0 %vm205_vm2, %v2238_v9  ;;  %2043 = vmatmul.mubr.msk.bf16.gmra.mxu1 %vm205_vm2, %v2239_v10  ;;  %v516_v30 = vsel %vm504_vm3, %v511_v23, %v515_v24  ;;  %v1020_v55 = vrot.slane %v1018_v47, 1  ;;  %v1198_v57 = vshll.u32 %v2264_v48, 16  ;;  %v1022_v58 = vshrl.u32 %v2263_v41, 16  ;;  %v2271_v17 = vld [vmem:[%s2343_s23 + $0x30] sm:$0xff]   ;;  %v2442_v25 = vld [vmem:[%s2343_s23 + $0x24] sm:$0x1f]  }
  0x19   : > { %2034 = vmatprep.mubr.msk.bf16.mxu0 %vm2290_vm1, %v2289_v1  ;;  %2048 = vmatprep.mubr.msk.bf16.mxu1 %vm2290_vm1, %v2289_v1  ;;  %v1008_v59 = vor.u32 %v1007_v51, %v1003_v42  ;;  %v1016_v60 = vor.u32 %v1014_v45, %v1012_v52  ;;  %v1203_v61 = vshll.u32 %v2265_v53, 16  ;;  %v1026_v62 = vshll.u32 %v2266_v54, 16  ;;  %v2273_v42 = vld [vmem:[%s2343_s23 + $0x40] sm:$0xff]  }
  0x1a   : > { %v1200_v63 = vrot.slane %v1198_v57, 1  ;;  %v1024_v0 = vor.u32 %v1022_v58, %v1020_v55  ;;  %v1207_v3 = vshrl.u32 %v2265_v53, 16  ;;  %v1030_v4 = vshrl.u32 %v2266_v54, 16  ;;  %v2276_v53 = vld [vmem:[%s2343_s23 + $0x48] sm:$0xff]  }
  0x1b   : > { %v2416_v5 = vsel %vm504_vm3, %v1008_v59, %v1012_v52  ;;  %v2419_v6 = vsel %vm504_vm3, %v1016_v60, %v1020_v55  ;;  %v1205_v7 = vrot.slane %v1203_v61, 1  ;;  %v1028_v8 = vrot.slane %v1026_v62, 1  ;;  %v2249_v54 = vld [vmem:[%s2343_s23 + $0x4c] ss:$0 sps:$4 sm:$0xff]   ;;  %v2486_v59 = vld [vmem:[%s2343_s23 + $0x50] sm:$0x1f]  }
  0x1c   : > { %v1201_v9 = vor.u32 %v1200_v63, %v1196_v56  ;;  %v1211_v10 = vshll.u32 %v2267_v2, 16  ;;  %v1219_v23 = vshll.u32 %v2269_v12, 16  ;;  %v532_v24 = vsel %vm504_vm3, %v527_v50, %v2395_v36 }
  0x1d   : > { %v2431_v13 = vsel %vm504_vm3, %v1024_v0, %v1028_v8  ;;  %v1209_v14 = vor.u32 %v1207_v3, %v1205_v7  ;;  %v1223_v26 = vshrl.u32 %v2269_v12, 16  ;;  %v1227_v33 = vshll.u32 %v2442_v25, 16  ;;  %v2253_v12 = vld [vmem:[%s2343_s23 + $0x84] sm:$0xff]  }
  0x1e   : > { %v2436_v19 = vsel %vm504_vm3, %v1201_v9, %v1205_v7  ;;  %v1213_v20 = vrot.slane %v1211_v10, 1  ;;  %v1389_v34 = vshrl.u32 %v2271_v17, 16  ;;  %v1391_v35 = vshll.u32 %v2271_v17, 16  ;;  %v1924_v10 = vld [vmem:[%s2772_s1 + $0xc] sm:$0x3] }
  0x1f   : > { %v2460_v43 = vrot.slane %v1227_v33, 1  ;;  %v535_v47 = vor.u32 %v533_v37, %v2395_v36  ;;  %v539_v48 = vrot.slane %v537_v40, 1  ;;  %v1408_v37 = vshrl.u32 %v2273_v42, 16  ;;  %v2254_v17 = vld [vmem:[%s2343_s23 + $0x68] sm:$0xff]  }
  0x20   : > { %2035 = vmatmul.mubr.msk.bf16.gmra.mxu0 %vm205_vm2, %v2240_v15  ;;  %2049 = vmatmul.mubr.msk.bf16.vlgmr.msra.gmra.mxu1 %vm205_vm2, %v2241_v16  ;;  %v1032_v15 = vor.u32 %v1030_v4, %v1028_v8  ;;  %v1215_v16 = vshrl.u32 %v2267_v2, 16  ;;  %v2446_v28 = vsel %vm504_vm3, %v1209_v14, %v1213_v20  ;;  %v1393_v44 = vrot.slane %v1391_v35, 1  ;;  %v2251_v8 = vld [vmem:[%s2343_s23 + $0x58] sm:$0xff]   ;;  %v2252_v14 = vld [vmem:[%s2343_s23 + $0x60] sm:$0xff]  }
  0x21   : > { %2070 = vmatprep.mubr.msk.bf16.mxu0 %vm2290_vm1, %v2289_v1  ;;  %2091 = vmatpush3.bf16.msra.mxu1 %v712_v21  ;;  %v1034_v21 = vshll.u32 %v2425_v11, 16  ;;  %v540_v40 = vsel %vm504_vm3, %v535_v47, %v539_v48  ;;  %v1412_v56 = vshll.u32 %v2276_v53, 16  ;;  %v1416_v60 = vshrl.u32 %v2276_v53, 16 }
  0x22   : > { %2052 = vmatprep.mubr.msk.bf16.mxu1 %vm2290_vm1, %v2289_v1  ;;  %2134 = vmatprep.subr.bf16.mxu1 %v2289_v1  ;;  %v1394_v51 = vor.u32 %v1393_v44, %v1389_v34  ;;  %v541_v62 = vshrl.u32 %v2391_v31, 16  ;;  %v1420_v63 = vshll.u32 %v2486_v59, 16  ;;  %v1913_v31 = vld [vmem:[%s2772_s1 + $0xa] sm:$0x3]  ;;  %v2277_v34 = vld [vmem:[%s2343_s23 + $0x14] sm:$0xff]   ;;  %v1424_v44 = vshrl.u32 %v2486_v59, 16 }
  0x23   : > { %v2448_v29 = vrot.slane %v1034_v21, 1  ;;  %v1414_v61 = vrot.slane %v1412_v56, 1  ;;  %v1057_v9 = vsel %vm221_vm0, %v1913_v31, 0  ;;  %v2259_v21 = vld [vmem:[%s2343_s23 + $0x9c] sm:$0xff]   ;;  %v1585_v35 = vrot.slane %v2277_v34, 1 }
  0x24   : > { %v2499_v3 = vrot.slane %v1420_v63, 1  ;;  %v543_v4 = vor.u32 %v541_v62, %v539_v48 }
  0x25   : > { %v2453_v38 = vsel %vm504_vm3, %v1032_v15, %v2448_v29  ;;  %v1418_v2 = vor.u32 %v1416_v60, %v1414_v61  ;;  %v1250_v15 = vsel %vm221_vm0, %v1924_v10, 0 }
  0x27   : > { %v2506_v7 = vsel %vm504_vm3, %v1418_v2, %v2499_v3 }
  0x28   : > { %2071 = vmatmul.mubr.msk.bf16.vlgmr.msra.gmra.mxu0 %vm205_vm2, %v516_v30  ;;  %2053 = vmatmul.mubr.msk.bf16.gmra.mxu1 %vm205_vm2, %v2242_v27  ;;  %v2272_v27 = vld [vmem:[%s2343_s23 + $0x38] sm:$0xff]   ;;  %v1217_v30 = vor.u32 %v1215_v16, %v1213_v20  ;;  %v2255_v16 = vld [vmem:[%s2343_s23 + $0x8c] sm:$0xff]  }
  0x29   : > { %2113 = vmatpush3.bf16.msra.mxu0 %v864_v32  ;;  %2056 = vmatprep.mubr.msk.bf16.mxu1 %vm2290_vm1, %v2289_v1  ;;  %v1221_v32 = vrot.slane %v1219_v23, 1  ;;  %v1396_v45 = vshll.u32 %v2272_v27, 16  ;;  %v2256_v20 = vld [vmem:[%s2343_s23 + $0x70] sm:$0xff]   ;;  %v2258_v23 = vld [vmem:[%s2343_s23 + $0x78] ss:$0 sps:$4 sm:$0xff]  }
  0x2a   : > { %2074 = vmatprep.mubr.msk.bf16.mxu0 %vm2290_vm1, %v2289_v1  ;;  %2156 = vmatprep.subr.bf16.mxu0 %v2289_v1 }
  0x2b   : > { %v2456_v39 = vsel %vm504_vm3, %v1217_v30, %v1221_v32  ;;  %v1225_v41 = vor.u32 %v1223_v26, %v1221_v32  ;;  %v1398_v52 = vrot.slane %v1396_v45, 1  ;;  %v1945_v26 = vld [vmem:[%s2772_s1 + $0xe] sm:$0x3]  ;;  %v1956_v30 = vld [vmem:[%s2772_s1 + $0x10] sm:$0x3] }
  0x2c   : > { %v1607_v32 = vsel %vm221_vm0, %v1956_v30, 0 }
  0x2d   : > { %v2474_v50 = vsel %vm504_vm3, %v1225_v41, %v2460_v43  ;;  %v2479_v22 = vsel %vm504_vm3, %v1394_v51, %v1398_v52 }
  0x30   : > { %2075 = vmatmul.mubr.msk.bf16.gmra.mxu0 %vm205_vm2, %v524_v49  ;;  %2057 = vmatmul.mubr.msk.bf16.gmra.mxu1 %vm205_vm2, %v2245_v46  ;;  %v1400_v46 = vshrl.u32 %v2272_v27, 16  ;;  %v1404_v49 = vshll.u32 %v2273_v42, 16  ;;  %v1443_v27 = vsel %vm221_vm0, %v1945_v26, 0 }
  0x31   : > { %2078 = vmatprep.mubr.msk.bf16.mxu0 %vm2290_vm1, %v2289_v1  ;;  %2060 = vmatprep.mubr.msk.bf16.mxu1 %vm2290_vm1, %v2289_v1 }
  0x32   : > { %v1406_v55 = vrot.slane %v1404_v49, 1  ;;  %v1402_v36 = vor.u32 %v1400_v46, %v1398_v52  ;;  %v1426_v46 = vor.u32 %v1424_v44, %v2499_v3 }
  0x34   : > { %v2483_v57 = vsel %vm504_vm3, %v1402_v36, %v1406_v55  ;;  %v1410_v58 = vor.u32 %v1408_v37, %v1406_v55 }
  0x36   : > { %v2495_v0 = vsel %vm504_vm3, %v1410_v58, %v1414_v61 }
  0x38   : > { %2079 = vmatmul.mubr.msk.bf16.gmra.mxu0 %vm205_vm2, %v532_v24  ;;  %2061 = vmatmul.mubr.msk.bf16.gmra.mxu1 %vm205_vm2, %v2247_v18  ;;  %v2257_v18 = vld [vmem:[%s2343_s23 + $0x94] sm:$0xff]   ;;  %v2260_v24 = vld [vmem:[%s2343_s23 + $0xa4] ss:$0 sps:$4 sm:$0xff]  }
  0x39   : > { %2082 = vmatprep.mubr.msk.bf16.mxu0 %vm2290_vm1, %v2289_v1  ;;  %2064 = vmatprep.mubr.msk.bf16.mxu1 %vm2290_vm1, %v2289_v1 }
  0x40   : > { %2083 = vmatmul.mubr.msk.bf16.gmra.mxu0 %vm205_vm2, %v540_v40  ;;  %2065 = vmatmul.mubr.msk.bf16.gmra.mxu1 %vm205_vm2, %v2249_v54 }
  0x41   : > { %2086 = vmatprep.mubr.msk.bf16.mxu0 %vm2290_vm1, %v2289_v1  ;;  %2092 = vmatprep.mubr.msk.bf16.mxu1 %vm2290_vm1, %v2289_v1 }
  0x48   : > { %2087 = vmatmul.mubr.msk.bf16.gmra.mxu0 %vm205_vm2, %v543_v4  ;;  %2093 = vmatmul.mubr.msk.bf16.vlgmr.msra.gmra.mxu1 %vm205_vm2, %v2251_v8 }
  0x49   : > { %2114 = vmatprep.mubr.msk.bf16.mxu0 %vm2290_vm1, %v2289_v1  ;;  %2135 = vmatpush3.bf16.msra.mxu1 %v1057_v9 }
  0x4a   : > { %2096 = vmatprep.mubr.msk.bf16.mxu1 %vm2290_vm1, %v2289_v1  ;;  %2178 = vmatprep.subr.bf16.mxu1 %v2289_v1 }
  0x50   : > { %2115 = vmatmul.mubr.msk.bf16.vlgmr.msra.gmra.mxu0 %vm205_vm2, %v2253_v12  ;;  %2097 = vmatmul.mubr.msk.bf16.gmra.mxu1 %vm205_vm2, %v2252_v14 }
  0x51   : > { %2157 = vmatpush3.bf16.msra.mxu0 %v1250_v15  ;;  %2100 = vmatprep.mubr.msk.bf16.mxu1 %vm2290_vm1, %v2289_v1 }
  0x52   : > { %2118 = vmatprep.mubr.msk.bf16.mxu0 %vm2290_vm1, %v2289_v1  ;;  %2200 = vmatprep.subr.bf16.mxu0 %v2289_v1 }
  0x58   : > { %2119 = vmatmul.mubr.msk.bf16.gmra.mxu0 %vm205_vm2, %v2255_v16  ;;  %2101 = vmatmul.mubr.msk.bf16.gmra.mxu1 %vm205_vm2, %v2254_v17 }
  0x59   : > { %2122 = vmatprep.mubr.msk.bf16.mxu0 %vm2290_vm1, %v2289_v1  ;;  %2104 = vmatprep.mubr.msk.bf16.mxu1 %vm2290_vm1, %v2289_v1 }
  0x60   : > { %2123 = vmatmul.mubr.msk.bf16.gmra.mxu0 %vm205_vm2, %v2257_v18  ;;  %2105 = vmatmul.mubr.msk.bf16.gmra.mxu1 %vm205_vm2, %v2256_v20 }
  0x61   : > { %2126 = vmatprep.mubr.msk.bf16.mxu0 %vm2290_vm1, %v2289_v1  ;;  %2108 = vmatprep.mubr.msk.bf16.mxu1 %vm2290_vm1, %v2289_v1 }
  0x68   : > { %2127 = vmatmul.mubr.msk.bf16.gmra.mxu0 %vm205_vm2, %v2259_v21  ;;  %2109 = vmatmul.mubr.msk.bf16.gmra.mxu1 %vm205_vm2, %v2258_v23 }
  0x69   : > { %2130 = vmatprep.mubr.msk.bf16.mxu0 %vm2290_vm1, %v2289_v1  ;;  %2136 = vmatprep.mubr.msk.bf16.mxu1 %vm2290_vm1, %v2289_v1 }
  0x70   : > { %2131 = vmatmul.mubr.msk.bf16.gmra.mxu0 %vm205_vm2, %v2260_v24  ;;  %2137 = vmatmul.mubr.msk.bf16.vlgmr.msra.gmra.mxu1 %vm205_vm2, %v2416_v5  ;;  %v1038_v5 = vshrl.u32 %v2425_v11, 16 }
  0x71   : > { %2158 = vmatprep.mubr.msk.bf16.mxu0 %vm2290_vm1, %v2289_v1  ;;  %2179 = vmatpush3.bf16.msra.mxu1 %v1443_v27 }
  0x72   : > { %2140 = vmatprep.mubr.msk.bf16.mxu1 %vm2290_vm1, %v2289_v1 }
  0x78   : > { %2159 = vmatmul.mubr.msk.bf16.vlgmr.msra.gmra.mxu0 %vm205_vm2, %v2436_v19  ;;  %2141 = vmatmul.mubr.msk.bf16.gmra.mxu1 %vm205_vm2, %v2419_v6  ;;  %v1040_v6 = vor.u32 %v1038_v5, %v2448_v29  ;;  %v2274_v19 = vld [vmem:[%s2343_s23 + $0x4] sm:$0xfe]  }
  0x79   : > { %2201 = vmatpush3.bf16.msra.mxu0 %v1607_v32  ;;  %2144 = vmatprep.mubr.msk.bf16.mxu1 %vm2290_vm1, %v2289_v1 }
  0x7a   : > { %2162 = vmatprep.mubr.msk.bf16.mxu0 %vm2290_vm1, %v2289_v1 }
  0x80   : > { %2163 = vmatmul.mubr.msk.bf16.gmra.mxu0 %vm205_vm2, %v2446_v28  ;;  %2145 = vmatmul.mubr.msk.bf16.gmra.mxu1 %vm205_vm2, %v2431_v13  ;;  %v1231_v13 = vshrl.u32 %v2442_v25, 16  ;;  %v2275_v28 = vld [vmem:[%s2343_s23 + $0xc] sm:$0xff]   ;;  %v1582_v25 = vrot.slane %v2274_v19, 1 }
  0x81   : > { %2166 = vmatprep.mubr.msk.bf16.mxu0 %vm2290_vm1, %v2289_v1  ;;  %2148 = vmatprep.mubr.msk.bf16.mxu1 %vm2290_vm1, %v2289_v1  ;;  %v1583_v29 = vrot.slane %v2275_v28, 1 }
  0x82   : > { %v1233_v11 = vor.u32 %v1231_v13, %v2460_v43  ;;  %v2280_v43 = vld [vmem:[%s2343_s23 + $0x24] sm:$0x1f]  }
  0x83   : > { %v1584_v33 = vsel %vm1581_vm4, %v1582_v25, %v1583_v29  ;;  %v1589_v45 = vrot.slane %v2280_v43, 1 }
  0x88   : > { %2167 = vmatmul.mubr.msk.bf16.gmra.mxu0 %vm205_vm2, %v2456_v39  ;;  %2149 = vmatmul.mubr.msk.bf16.gmra.mxu1 %vm205_vm2, %v2453_v38  ;;  %v1586_v38 = vsel %vm1581_vm4, %v1583_v29, %v1585_v35  ;;  %v2279_v39 = vld [vmem:[%s2343_s23 + $0x1c] sm:$0xff]  }
  0x89   : > { %2170 = vmatprep.mubr.msk.bf16.mxu0 %vm2290_vm1, %v2289_v1  ;;  %2152 = vmatprep.mubr.msk.bf16.mxu1 %vm2290_vm1, %v2289_v1  ;;  %v1587_v41 = vrot.slane %v2279_v39, 1 }
  0x8b   : > { %v1588_v42 = vsel %vm1581_vm4, %v1585_v35, %v1587_v41  ;;  %v1590_v47 = vsel %vm1581_vm4, %v1587_v41, %v1589_v45 }
  0x90   : > { %2171 = vmatmul.mubr.msk.bf16.gmra.mxu0 %vm205_vm2, %v2474_v50  ;;  %2153 = vmatmul.mubr.msk.bf16.gmra.mxu1 %vm205_vm2, %v1040_v6 }
  0x91   : > { %2174 = vmatprep.mubr.msk.bf16.mxu0 %vm2290_vm1, %v2289_v1  ;;  %2180 = vmatprep.mubr.msk.bf16.mxu1 %vm2290_vm1, %v2289_v1 }
  0x98   : > { %2175 = vmatmul.mubr.msk.bf16.gmra.mxu0 %vm205_vm2, %v1233_v11  ;;  %2181 = vmatmul.mubr.msk.bf16.vlgmr.msra.gmra.mxu1 %vm205_vm2, %v2479_v22 }
  0x99   : > { %2202 = vmatprep.mubr.msk.bf16.mxu0 %vm2290_vm1, %v2289_v1  ;;  %2184 = vmatprep.mubr.msk.bf16.mxu1 %vm2290_vm1, %v2289_v1 }
  0xa0   : > { %2203 = vmatmul.mubr.msk.bf16.vlgmr.msra.gmra.mxu0 %vm205_vm2, %v1584_v33  ;;  %2185 = vmatmul.mubr.msk.bf16.gmra.mxu1 %vm205_vm2, %v2483_v57 }
  0xa1   : > { %2206 = vmatprep.mubr.msk.bf16.mxu0 %vm2290_vm1, %v2289_v1  ;;  %2188 = vmatprep.mubr.msk.bf16.mxu1 %vm2290_vm1, %v2289_v1 }
  0xa8   : > { %2207 = vmatmul.mubr.msk.bf16.gmra.mxu0 %vm205_vm2, %v1586_v38  ;;  %2189 = vmatmul.mubr.msk.bf16.gmra.mxu1 %vm205_vm2, %v2495_v0 }
  0xa9   : > { %2210 = vmatprep.mubr.msk.bf16.mxu0 %vm2290_vm1, %v2289_v1  ;;  %2192 = vmatprep.mubr.msk.bf16.mxu1 %vm2290_vm1, %v2289_v1 }
  0xb0   : > { %2211 = vmatmul.mubr.msk.bf16.gmra.mxu0 %vm205_vm2, %v1588_v42  ;;  %2193 = vmatmul.mubr.msk.bf16.gmra.mxu1 %vm205_vm2, %v2506_v7 }
  0xb1   : > { %2214 = vmatprep.mubr.msk.bf16.mxu0 %vm2290_vm1, %v2289_v1  ;;  %2196 = vmatprep.mubr.msk.bf16.mxu1 %vm2290_vm1, %v2289_v1 }
  0xb8   : > { %2215 = vmatmul.mubr.msk.bf16.gmra.mxu0 %vm205_vm2, %v1590_v47  ;;  %2197 = vmatmul.mubr.msk.bf16.gmra.mxu1 %vm205_vm2, %v1426_v46 }
  0xb9   : > { %2218 = vmatprep.mubr.msk.bf16.mxu0 %vm2290_vm1, %v2289_v1 }
  0xc0   : > { %2219 = vmatmul.mubr.msk.bf16.gmra.mxu0 %vm205_vm2, %v1589_v45 }
  0xd0   : > { %v259_v48 = vpop.f32.mrf.mxu0  ;;  %v283_v49 = vpop.f32.mrf.mxu1 }
  0xd1   : > { %297 = vst.msk [vmem:[#allocation2] sm:$0xff] %vm205_vm2, %v259_v48  ;;  %303 = vst.msk [vmem:[#allocation2 + $0x30] sm:$0xff] %vm205_vm2, %v283_v49 }
  0xd2   : > { %v2028_v50 = vpop.f32.mrf.mxu0  ;;  %v2040_v51 = vpop.f32.mrf.mxu1 }
  0xd4   : > { %v262_v52 = vpop.f32.mrf.mxu0  ;;  %v286_v53 = vpop.f32.mrf.mxu1 }
  0xd5   : > { %298 = vst.msk [vmem:[#allocation2 + $0x8] sm:$0xff] %vm205_vm2, %v262_v52  ;;  %304 = vst.msk [vmem:[#allocation2 + $0x38] sm:$0xff] %vm205_vm2, %v286_v53 }
  0xd6   : > { %v2029_v54 = vpop.f32.mrf.mxu0  ;;  %v2041_v55 = vpop.f32.mrf.mxu1 }
  0xd8   : > { %v267_v22 = vpop.f32.mrf.mxu0  ;;  %v291_v1 = vpop.f32.mrf.mxu1  ;;  %v306_v60 = vld [vmem:[#allocation2] sm:$0xff]  ;;  %v312_v45 = vld [vmem:[#allocation2 + $0x30] sm:$0xff] }
  0xd9   : > { %299 = vst.msk [vmem:[#allocation2 + $0x10] sm:$0xff] %vm205_vm2, %v267_v22  ;;  %305 = vst.msk [vmem:[#allocation2 + $0x40] sm:$0xff] %vm205_vm2, %v291_v1 }
  0xda   : > { %v2032_v36 = vpop.f32.mrf.mxu0  ;;  %v2044_v37 = vpop.f32.mrf.mxu1 }
  0xdc   : > { %v270_v40 = vpop.f32.mrf.mxu0  ;;  %v294_v56 = vpop.f32.mrf.mxu1  ;;  %v307_v3 = vld [vmem:[#allocation2 + $0x8] sm:$0xff]  ;;  %v313_v53 = vld [vmem:[#allocation2 + $0x38] sm:$0xff] }
  0xdd   : > { %300 = vst.msk [vmem:[#allocation2 + $0x18] sm:$0xff] %vm205_vm2, %v270_v40 }
  0xde   : > { %v2033_v57 = vpop.f32.mrf.mxu0  ;;  %v2045_v58 = vpop.f32.mrf.mxu1 }
  0xe0   : > { %v275_v59 = vpop.f32.mrf.mxu0  ;;  %v402_v61 = vpop.f32.mrf.mxu1  ;;  %v308_v10 = vld [vmem:[#allocation2 + $0x10] sm:$0xff]  ;;  %v314_v56 = vld [vmem:[#allocation2 + $0x40] sm:$0xff] }
  0xe1   : > { %301 = vst.msk [vmem:[#allocation2 + $0x20] sm:$0xff] %vm205_vm2, %v275_v59  ;;  %v440_v62 = vadd.f32 %v402_v61, %v306_v60 }
  0xe2   : > { %v2036_v63 = vpop.f32.mrf.mxu0  ;;  %v2050_v0 = vpop.f32.mrf.mxu1 }
  0xe3   : > { %449 = vst.msk [vmem:[#allocation2] sm:$0xff] %vm205_vm2, %v440_v62 }
  0xe4   : > { %v278_v2 = vpop.f32.mrf.mxu0  ;;  %v405_v4 = vpop.f32.mrf.mxu1  ;;  %v309_v21 = vld [vmem:[#allocation2 + $0x18] sm:$0xff] }
  0xe5   : > { %302 = vst.msk [vmem:[#allocation2 + $0x28] sm:$0xff] %vm205_vm2, %v278_v2  ;;  %v441_v31 = vadd.f32 %v405_v4, %v307_v3 }
  0xe6   : > { %v2037_v7 = vpop.f32.mrf.mxu0  ;;  %v2051_v8 = vpop.f32.mrf.mxu1 }
  0xe7   : > { %450 = vst.msk [vmem:[#allocation2 + $0x8] sm:$0xff] %vm205_vm2, %v441_v31 }
  0xe8   : > { %v596_v9 = vpop.f32.mrf.mxu0  ;;  %v410_v12 = vpop.f32.mrf.mxu1  ;;  %v310_v6 = vld [vmem:[#allocation2 + $0x20] sm:$0xff] }
  0xe9   : > { %v442_v14 = vadd.f32 %v410_v12, %v308_v10 }
  0xea   : > { %v2072_v15 = vpop.f32.mrf.mxu0  ;;  %v458_v16 = vld [vmem:[#allocation2] sm:$0xff]  ;;  %v2054_v17 = vpop.f32.mrf.mxu1 }
  0xeb   : > { %451 = vst.msk [vmem:[#allocation2 + $0x10] sm:$0xff] %vm205_vm2, %v442_v14  ;;  %v634_v18 = vadd.f32 %v596_v9, %v458_v16 }
  0xec   : > { %v599_v20 = vpop.f32.mrf.mxu0  ;;  %v413_v23 = vpop.f32.mrf.mxu1  ;;  %v311_v34 = vld [vmem:[#allocation2 + $0x28] sm:$0xff] }
  0xed   : > { %643 = vst.msk [vmem:[#allocation2] sm:$0xff] %vm205_vm2, %v634_v18  ;;  %v443_v24 = vadd.f32 %v413_v23, %v309_v21 }
  0xee   : > { %v2073_v26 = vpop.f32.mrf.mxu0  ;;  %v459_v27 = vld [vmem:[#allocation2 + $0x8] sm:$0xff]  ;;  %v2055_v30 = vpop.f32.mrf.mxu1 }
  0xef   : > { %452 = vst.msk [vmem:[#allocation2 + $0x18] sm:$0xff] %vm205_vm2, %v443_v24  ;;  %v635_v32 = vadd.f32 %v599_v20, %v459_v27 }
  0xf0   : > { %v604_v5 = vpop.f32.mrf.mxu0  ;;  %v418_v13 = vpop.f32.mrf.mxu1 }
  0xf1   : > { %644 = vst.msk [vmem:[#allocation2 + $0x8] sm:$0xff] %vm205_vm2, %v635_v32  ;;  %v444_v11 = vadd.f32 %v418_v13, %v310_v6 }
  0xf2   : > { %v2076_v19 = vpop.f32.mrf.mxu0  ;;  %v460_v28 = vld [vmem:[#allocation2 + $0x10] sm:$0xff]  ;;  %v2058_v25 = vpop.f32.mrf.mxu1 }
  0xf3   : > { %453 = vst.msk [vmem:[#allocation2 + $0x20] sm:$0xff] %vm205_vm2, %v444_v11  ;;  %v636_v29 = vadd.f32 %v604_v5, %v460_v28 }
  0xf4   : > { %v607_v33 = vpop.f32.mrf.mxu0  ;;  %v421_v35 = vpop.f32.mrf.mxu1  ;;  %v652_v8 = vld [vmem:[#allocation2] sm:$0xff] }
  0xf5   : > { %645 = vst.msk [vmem:[#allocation2 + $0x10] sm:$0xff] %vm205_vm2, %v636_v29  ;;  %v445_v38 = vadd.f32 %v421_v35, %v311_v34 }
  0xf6   : > { %v2077_v39 = vpop.f32.mrf.mxu0  ;;  %v461_v41 = vld [vmem:[#allocation2 + $0x18] sm:$0xff]  ;;  %v2059_v42 = vpop.f32.mrf.mxu1 }
  0xf7   : > { %454 = vst.msk [vmem:[#allocation2 + $0x28] sm:$0xff] %vm205_vm2, %v445_v38  ;;  %v637_v43 = vadd.f32 %v607_v33, %v461_v41 }
  0xf8   : > { %v612_v44 = vpop.f32.mrf.mxu0  ;;  %v426_v46 = vpop.f32.mrf.mxu1  ;;  %v653_v18 = vld [vmem:[#allocation2 + $0x8] sm:$0xff] }
  0xf9   : > { %646 = vst.msk [vmem:[#allocation2 + $0x18] sm:$0xff] %vm205_vm2, %v637_v43  ;;  %v446_v47 = vadd.f32 %v426_v46, %v312_v45 }
  0xfa   : > { %v2080_v48 = vpop.f32.mrf.mxu0  ;;  %v462_v49 = vld [vmem:[#allocation2 + $0x20] sm:$0xff]  ;;  %v2062_v50 = vpop.f32.mrf.mxu1 }
  0xfb   : > { %455 = vst.msk [vmem:[#allocation2 + $0x30] sm:$0xff] %vm205_vm2, %v446_v47  ;;  %v638_v51 = vadd.f32 %v612_v44, %v462_v49 }
  0xfc   : > { %v615_v52 = vpop.f32.mrf.mxu0  ;;  %v429_v54 = vpop.f32.mrf.mxu1  ;;  %v654_v27 = vld [vmem:[#allocation2 + $0x10] sm:$0xff] }
  0xfd   : > { %647 = vst.msk [vmem:[#allocation2 + $0x20] sm:$0xff] %vm205_vm2, %v638_v51  ;;  %v447_v55 = vadd.f32 %v429_v54, %v313_v53 }
  0xfe   : > { %v2081_v22 = vpop.f32.mrf.mxu0  ;;  %v463_v1 = vld [vmem:[#allocation2 + $0x28] sm:$0xff]  ;;  %v2063_v36 = vpop.f32.mrf.mxu1 }
  0xff   : > { %456 = vst.msk [vmem:[#allocation2 + $0x38] sm:$0xff] %vm205_vm2, %v447_v55  ;;  %v639_v37 = vadd.f32 %v615_v52, %v463_v1 }
 0x100   : > { %v620_v40 = vpop.f32.mrf.mxu0  ;;  %v434_v57 = vpop.f32.mrf.mxu1  ;;  %v655_v28 = vld [vmem:[#allocation2 + $0x18] sm:$0xff] }
 0x101   : > { %648 = vst.msk [vmem:[#allocation2 + $0x28] sm:$0xff] %vm205_vm2, %v639_v37  ;;  %v448_v58 = vadd.f32 %v434_v57, %v314_v56 }
 0x102   : > { %v2084_v59 = vpop.f32.mrf.mxu0  ;;  %v464_v60 = vld [vmem:[#allocation2 + $0x30] sm:$0xff]  ;;  %v2066_v61 = vpop.f32.mrf.mxu1 }
 0x103   : > { %457 = vst.msk [vmem:[#allocation2 + $0x40] sm:$0xff] %vm205_vm2, %v448_v58  ;;  %v640_v62 = vadd.f32 %v620_v40, %v464_v60 }
 0x104   : > { %v623_v63 = vpop.f32.mrf.mxu0  ;;  %v437_v0 = vpop.f32.mrf.mxu1  ;;  %v656_v41 = vld [vmem:[#allocation2 + $0x20] sm:$0xff] }
 0x105   : > { %649 = vst.msk [vmem:[#allocation2 + $0x30] sm:$0xff] %vm205_vm2, %v640_v62 }
 0x106   : > { %v2085_v2 = vpop.f32.mrf.mxu0  ;;  %v465_v3 = vld [vmem:[#allocation2 + $0x38] sm:$0xff]  ;;  %v2067_v4 = vpop.f32.mrf.mxu1 }
 0x107   : > { %v641_v31 = vadd.f32 %v623_v63, %v465_v3 }
 0x108   : > { %v628_v7 = vpop.f32.mrf.mxu0  ;;  %v748_v9 = vpop.f32.mrf.mxu1  ;;  %v657_v49 = vld [vmem:[#allocation2 + $0x28] sm:$0xff] }
 0x109   : > { %650 = vst.msk [vmem:[#allocation2 + $0x38] sm:$0xff] %vm205_vm2, %v641_v31  ;;  %v786_v10 = vadd.f32 %v748_v9, %v652_v8 }
 0x10a   : > { %v2088_v12 = vpop.f32.mrf.mxu0  ;;  %v466_v14 = vld [vmem:[#allocation2 + $0x40] sm:$0xff]  ;;  %v2094_v15 = vpop.f32.mrf.mxu1 }
 0x10b   : > { %v642_v16 = vadd.f32 %v628_v7, %v466_v14  ;;  %795 = vst.msk [vmem:[#allocation2] sm:$0xff] %vm205_vm2, %v786_v10 }
 0x10c   : > { %v631_v17 = vpop.f32.mrf.mxu0  ;;  %v751_v20 = vpop.f32.mrf.mxu1  ;;  %v658_v1 = vld [vmem:[#allocation2 + $0x30] sm:$0xff] }
 0x10d   : > { %651 = vst.msk [vmem:[#allocation2 + $0x40] sm:$0xff] %vm205_vm2, %v642_v16  ;;  %v787_v21 = vadd.f32 %v751_v20, %v653_v18 }
 0x10e   : > { %v2089_v23 = vpop.f32.mrf.mxu0  ;;  %v2095_v24 = vpop.f32.mrf.mxu1 }
 0x10f   : > { %796 = vst.msk [vmem:[#allocation2 + $0x8] sm:$0xff] %vm205_vm2, %v787_v21 }
 0x110   : > { %v900_v26 = vpop.f32.mrf.mxu0  ;;  %v756_v30 = vpop.f32.mrf.mxu1  ;;  %v659_v60 = vld [vmem:[#allocation2 + $0x38] sm:$0xff] }
 0x111   : > { %v788_v32 = vadd.f32 %v756_v30, %v654_v27 }
 0x112   : > { %v2116_v5 = vpop.f32.mrf.mxu0  ;;  %v804_v6 = vld [vmem:[#allocation2] sm:$0xff]  ;;  %v2098_v13 = vpop.f32.mrf.mxu1 }
 0x113   : > { %797 = vst.msk [vmem:[#allocation2 + $0x10] sm:$0xff] %vm205_vm2, %v788_v32  ;;  %v938_v11 = vadd.f32 %v900_v26, %v804_v6 }
 0x114   : > { %v903_v19 = vpop.f32.mrf.mxu0  ;;  %v759_v25 = vpop.f32.mrf.mxu1  ;;  %v660_v31 = vld [vmem:[#allocation2 + $0x40] sm:$0xff] }
 0x115   : > { %947 = vst.msk [vmem:[#allocation2] sm:$0xff] %vm205_vm2, %v938_v11  ;;  %v789_v29 = vadd.f32 %v759_v25, %v655_v28 }
 0x116   : > { %v2117_v33 = vpop.f32.mrf.mxu0  ;;  %v805_v34 = vld [vmem:[#allocation2 + $0x8] sm:$0xff]  ;;  %v2099_v35 = vpop.f32.mrf.mxu1 }
 0x117   : > { %798 = vst.msk [vmem:[#allocation2 + $0x18] sm:$0xff] %vm205_vm2, %v789_v29  ;;  %v939_v38 = vadd.f32 %v903_v19, %v805_v34 }
 0x118   : > { %v908_v39 = vpop.f32.mrf.mxu0  ;;  %v764_v42 = vpop.f32.mrf.mxu1 }
 0x119   : > { %948 = vst.msk [vmem:[#allocation2 + $0x8] sm:$0xff] %vm205_vm2, %v939_v38  ;;  %v790_v43 = vadd.f32 %v764_v42, %v656_v41 }
 0x11a   : > { %v2120_v44 = vpop.f32.mrf.mxu0  ;;  %v806_v45 = vld [vmem:[#allocation2 + $0x10] sm:$0xff]  ;;  %v2102_v46 = vpop.f32.mrf.mxu1 }
 0x11b   : > { %799 = vst.msk [vmem:[#allocation2 + $0x20] sm:$0xff] %vm205_vm2, %v790_v43  ;;  %v940_v47 = vadd.f32 %v908_v39, %v806_v45 }
 0x11c   : > { %v911_v48 = vpop.f32.mrf.mxu0  ;;  %v767_v50 = vpop.f32.mrf.mxu1  ;;  %v956_v24 = vld [vmem:[#allocation2] sm:$0xff] }
 0x11d   : > { %949 = vst.msk [vmem:[#allocation2 + $0x10] sm:$0xff] %vm205_vm2, %v940_v47  ;;  %v791_v51 = vadd.f32 %v767_v50, %v657_v49 }
 0x11e   : > { %v2121_v52 = vpop.f32.mrf.mxu0  ;;  %v807_v53 = vld [vmem:[#allocation2 + $0x18] sm:$0xff]  ;;  %v2103_v54 = vpop.f32.mrf.mxu1 }
 0x11f   : > { %800 = vst.msk [vmem:[#allocation2 + $0x28] sm:$0xff] %vm205_vm2, %v791_v51  ;;  %v941_v55 = vadd.f32 %v911_v48, %v807_v53 }
 0x120   : > { %v916_v22 = vpop.f32.mrf.mxu0  ;;  %v772_v36 = vpop.f32.mrf.mxu1  ;;  %v957_v11 = vld [vmem:[#allocation2 + $0x8] sm:$0xff] }
 0x121   : > { %950 = vst.msk [vmem:[#allocation2 + $0x18] sm:$0xff] %vm205_vm2, %v941_v55  ;;  %v792_v37 = vadd.f32 %v772_v36, %v658_v1 }
 0x122   : > { %v2124_v40 = vpop.f32.mrf.mxu0  ;;  %v808_v56 = vld [vmem:[#allocation2 + $0x20] sm:$0xff]  ;;  %v2106_v57 = vpop.f32.mrf.mxu1 }
 0x123   : > { %801 = vst.msk [vmem:[#allocation2 + $0x30] sm:$0xff] %vm205_vm2, %v792_v37  ;;  %v942_v58 = vadd.f32 %v916_v22, %v808_v56 }
 0x124   : > { %v919_v59 = vpop.f32.mrf.mxu0  ;;  %v775_v61 = vpop.f32.mrf.mxu1  ;;  %v958_v34 = vld [vmem:[#allocation2 + $0x10] sm:$0xff] }
 0x125   : > { %951 = vst.msk [vmem:[#allocation2 + $0x20] sm:$0xff] %vm205_vm2, %v942_v58  ;;  %v793_v62 = vadd.f32 %v775_v61, %v659_v60 }
 0x126   : > { %v2125_v63 = vpop.f32.mrf.mxu0  ;;  %v809_v0 = vld [vmem:[#allocation2 + $0x28] sm:$0xff]  ;;  %v2107_v2 = vpop.f32.mrf.mxu1 }
 0x127   : > { %802 = vst.msk [vmem:[#allocation2 + $0x38] sm:$0xff] %vm205_vm2, %v793_v62  ;;  %v943_v3 = vadd.f32 %v919_v59, %v809_v0 }
 0x128   : > { %v924_v4 = vpop.f32.mrf.mxu0  ;;  %v780_v7 = vpop.f32.mrf.mxu1  ;;  %v959_v45 = vld [vmem:[#allocation2 + $0x18] sm:$0xff] }
 0x129   : > { %952 = vst.msk [vmem:[#allocation2 + $0x28] sm:$0xff] %vm205_vm2, %v943_v3  ;;  %v794_v8 = vadd.f32 %v780_v7, %v660_v31 }
 0x12a   : > { %v2128_v9 = vpop.f32.mrf.mxu0  ;;  %v810_v10 = vld [vmem:[#allocation2 + $0x30] sm:$0xff]  ;;  %v2110_v12 = vpop.f32.mrf.mxu1 }
 0x12b   : > { %803 = vst.msk [vmem:[#allocation2 + $0x40] sm:$0xff] %vm205_vm2, %v794_v8  ;;  %v944_v14 = vadd.f32 %v924_v4, %v810_v10 }
 0x12c   : > { %v927_v15 = vpop.f32.mrf.mxu0  ;;  %v783_v16 = vpop.f32.mrf.mxu1  ;;  %v960_v53 = vld [vmem:[#allocation2 + $0x20] sm:$0xff] }
 0x12d   : > { %953 = vst.msk [vmem:[#allocation2 + $0x30] sm:$0xff] %vm205_vm2, %v944_v14 }
 0x12e   : > { %v2129_v17 = vpop.f32.mrf.mxu0  ;;  %v811_v18 = vld [vmem:[#allocation2 + $0x38] sm:$0xff]  ;;  %v2111_v20 = vpop.f32.mrf.mxu1 }
 0x12f   : > { %v945_v21 = vadd.f32 %v927_v15, %v811_v18 }
 0x130   : > { %v932_v23 = vpop.f32.mrf.mxu0  ;;  %v1093_v26 = vpop.f32.mrf.mxu1  ;;  %v961_v56 = vld [vmem:[#allocation2 + $0x28] sm:$0xff] }
 0x131   : > { %954 = vst.msk [vmem:[#allocation2 + $0x38] sm:$0xff] %vm205_vm2, %v945_v21  ;;  %v1131_v27 = vadd.f32 %v1093_v26, %v956_v24 }
 0x132   : > { %v2132_v30 = vpop.f32.mrf.mxu0  ;;  %v812_v32 = vld [vmem:[#allocation2 + $0x40] sm:$0xff]  ;;  %v2138_v5 = vpop.f32.mrf.mxu1 }
 0x133   : > { %v946_v6 = vadd.f32 %v932_v23, %v812_v32  ;;  %1140 = vst.msk [vmem:[#allocation2] sm:$0xff] %vm205_vm2, %v1131_v27 }
 0x134   : > { %v935_v13 = vpop.f32.mrf.mxu0  ;;  %v1096_v19 = vpop.f32.mrf.mxu1  ;;  %v962_v0 = vld [vmem:[#allocation2 + $0x30] sm:$0xff] }
 0x135   : > { %955 = vst.msk [vmem:[#allocation2 + $0x40] sm:$0xff] %vm205_vm2, %v946_v6  ;;  %v1132_v28 = vadd.f32 %v1096_v19, %v957_v11 }
 0x136   : > { %v2133_v25 = vpop.f32.mrf.mxu0  ;;  %v2139_v29 = vpop.f32.mrf.mxu1 }
 0x137   : > { %1141 = vst.msk [vmem:[#allocation2 + $0x8] sm:$0xff] %vm205_vm2, %v1132_v28 }
 0x138   : > { %v1286_v33 = vpop.f32.mrf.mxu0  ;;  %v1101_v35 = vpop.f32.mrf.mxu1  ;;  %v963_v10 = vld [vmem:[#allocation2 + $0x38] sm:$0xff] }
 0x139   : > { %v1133_v38 = vadd.f32 %v1101_v35, %v958_v34 }
 0x13a   : > { %v2160_v39 = vpop.f32.mrf.mxu0  ;;  %v1149_v41 = vld [vmem:[#allocation2] sm:$0xff]  ;;  %v2142_v42 = vpop.f32.mrf.mxu1 }
 0x13b   : > { %1142 = vst.msk [vmem:[#allocation2 + $0x10] sm:$0xff] %vm205_vm2, %v1133_v38  ;;  %v1324_v43 = vadd.f32 %v1286_v33, %v1149_v41 }
 0x13c   : > { %v1289_v44 = vpop.f32.mrf.mxu0  ;;  %v1104_v46 = vpop.f32.mrf.mxu1  ;;  %v964_v21 = vld [vmem:[#allocation2 + $0x40] sm:$0xff] }
 0x13d   : > { %1333 = vst.msk [vmem:[#allocation2] sm:$0xff] %vm205_vm2, %v1324_v43  ;;  %v1134_v47 = vadd.f32 %v1104_v46, %v959_v45 }
 0x13e   : > { %v2161_v48 = vpop.f32.mrf.mxu0  ;;  %v1150_v49 = vld [vmem:[#allocation2 + $0x8] sm:$0xff]  ;;  %v2143_v50 = vpop.f32.mrf.mxu1 }
 0x13f   : > { %1143 = vst.msk [vmem:[#allocation2 + $0x18] sm:$0xff] %vm205_vm2, %v1134_v47  ;;  %v1325_v51 = vadd.f32 %v1289_v44, %v1150_v49 }
 0x140   : > { %v1294_v52 = vpop.f32.mrf.mxu0  ;;  %v1109_v54 = vpop.f32.mrf.mxu1 }
 0x141   : > { %1334 = vst.msk [vmem:[#allocation2 + $0x8] sm:$0xff] %vm205_vm2, %v1325_v51  ;;  %v1135_v55 = vadd.f32 %v1109_v54, %v960_v53 }
 0x142   : > { %v2164_v22 = vpop.f32.mrf.mxu0  ;;  %v1151_v1 = vld [vmem:[#allocation2 + $0x10] sm:$0xff]  ;;  %v2146_v36 = vpop.f32.mrf.mxu1 }
 0x143   : > { %1144 = vst.msk [vmem:[#allocation2 + $0x20] sm:$0xff] %vm205_vm2, %v1135_v55  ;;  %v1326_v37 = vadd.f32 %v1294_v52, %v1151_v1 }
 0x144   : > { %v1297_v40 = vpop.f32.mrf.mxu0  ;;  %v1112_v57 = vpop.f32.mrf.mxu1  ;;  %v1342_v29 = vld [vmem:[#allocation2] sm:$0xff] }
 0x145   : > { %1335 = vst.msk [vmem:[#allocation2 + $0x10] sm:$0xff] %vm205_vm2, %v1326_v37  ;;  %v1136_v58 = vadd.f32 %v1112_v57, %v961_v56 }
 0x146   : > { %v2165_v59 = vpop.f32.mrf.mxu0  ;;  %v1152_v60 = vld [vmem:[#allocation2 + $0x18] sm:$0xff]  ;;  %v2147_v61 = vpop.f32.mrf.mxu1 }
 0x147   : > { %1145 = vst.msk [vmem:[#allocation2 + $0x28] sm:$0xff] %vm205_vm2, %v1136_v58  ;;  %v1327_v62 = vadd.f32 %v1297_v40, %v1152_v60 }
 0x148   : > { %v1302_v63 = vpop.f32.mrf.mxu0  ;;  %v1117_v2 = vpop.f32.mrf.mxu1  ;;  %v1343_v43 = vld [vmem:[#allocation2 + $0x8] sm:$0xff] }
 0x149   : > { %1336 = vst.msk [vmem:[#allocation2 + $0x18] sm:$0xff] %vm205_vm2, %v1327_v62  ;;  %v1137_v3 = vadd.f32 %v1117_v2, %v962_v0  ;;  %v2721_v0 = vld [vmem:[%s2773_s2] ss:$0 sm:$0xff] }
 0x14a   : > { %v2168_v4 = vpop.f32.mrf.mxu0  ;;  %v1153_v31 = vld [vmem:[#allocation2 + $0x20] sm:$0xff]  ;;  %v2150_v7 = vpop.f32.mrf.mxu1 }
 0x14b   : > { %1146 = vst.msk [vmem:[#allocation2 + $0x30] sm:$0xff] %vm205_vm2, %v1137_v3  ;;  %v1328_v8 = vadd.f32 %v1302_v63, %v1153_v31 }
 0x14c   : > { %v1305_v9 = vpop.f32.mrf.mxu0  ;;  %v1120_v12 = vpop.f32.mrf.mxu1  ;;  %v1344_v49 = vld [vmem:[#allocation2 + $0x10] sm:$0xff] }
 0x14d   : > { %1337 = vst.msk [vmem:[#allocation2 + $0x20] sm:$0xff] %vm205_vm2, %v1328_v8  ;;  %v1138_v14 = vadd.f32 %v1120_v12, %v963_v10 }
 0x14e   : > { %v2169_v15 = vpop.f32.mrf.mxu0  ;;  %v1154_v16 = vld [vmem:[#allocation2 + $0x28] sm:$0xff]  ;;  %v2151_v17 = vpop.f32.mrf.mxu1 }
 0x14f   : > { %1147 = vst.msk [vmem:[#allocation2 + $0x38] sm:$0xff] %vm205_vm2, %v1138_v14  ;;  %v1329_v18 = vadd.f32 %v1305_v9, %v1154_v16 }
 0x150   : > { %v1310_v20 = vpop.f32.mrf.mxu0  ;;  %v1125_v23 = vpop.f32.mrf.mxu1  ;;  %v1345_v1 = vld [vmem:[#allocation2 + $0x18] sm:$0xff] }
 0x151   : > { %1338 = vst.msk [vmem:[#allocation2 + $0x28] sm:$0xff] %vm205_vm2, %v1329_v18  ;;  %v1139_v24 = vadd.f32 %v1125_v23, %v964_v21 }
 0x152   : > { %v2172_v26 = vpop.f32.mrf.mxu0  ;;  %v1155_v27 = vld [vmem:[#allocation2 + $0x30] sm:$0xff]  ;;  %v2154_v30 = vpop.f32.mrf.mxu1 }
 0x153   : > { %1148 = vst.msk [vmem:[#allocation2 + $0x40] sm:$0xff] %vm205_vm2, %v1139_v24  ;;  %v1330_v32 = vadd.f32 %v1310_v20, %v1155_v27 }
 0x154   : > { %v1313_v5 = vpop.f32.mrf.mxu0  ;;  %v1128_v6 = vpop.f32.mrf.mxu1  ;;  %v1346_v60 = vld [vmem:[#allocation2 + $0x20] sm:$0xff] }
 0x155   : > { %1339 = vst.msk [vmem:[#allocation2 + $0x30] sm:$0xff] %vm205_vm2, %v1330_v32 }
 0x156   : > { %v2173_v13 = vpop.f32.mrf.mxu0  ;;  %v1156_v11 = vld [vmem:[#allocation2 + $0x38] sm:$0xff]  ;;  %v2155_v19 = vpop.f32.mrf.mxu1 }
 0x157   : > { %v1331_v28 = vadd.f32 %v1313_v5, %v1156_v11 }
 0x158   : > { %v1318_v25 = vpop.f32.mrf.mxu0  ;;  %v1479_v33 = vpop.f32.mrf.mxu1  ;;  %v1347_v8 = vld [vmem:[#allocation2 + $0x28] sm:$0xff] }
 0x159   : > { %1340 = vst.msk [vmem:[#allocation2 + $0x38] sm:$0xff] %vm205_vm2, %v1331_v28  ;;  %v1517_v34 = vadd.f32 %v1479_v33, %v1342_v29 }
 0x15a   : > { %v2176_v35 = vpop.f32.mrf.mxu0  ;;  %v1157_v38 = vld [vmem:[#allocation2 + $0x40] sm:$0xff]  ;;  %v2182_v39 = vpop.f32.mrf.mxu1 }
 0x15b   : > { %v1332_v41 = vadd.f32 %v1318_v25, %v1157_v38  ;;  %1526 = vst.msk [vmem:[#allocation2] sm:$0xff] %vm205_vm2, %v1517_v34 }
 0x15c   : > { %v1321_v42 = vpop.f32.mrf.mxu0  ;;  %v1482_v44 = vpop.f32.mrf.mxu1  ;;  %v1348_v23 = vld [vmem:[#allocation2 + $0x30] sm:$0xff] }
 0x15d   : > { %1341 = vst.msk [vmem:[#allocation2 + $0x40] sm:$0xff] %vm205_vm2, %v1332_v41  ;;  %v1518_v45 = vadd.f32 %v1482_v44, %v1343_v43 }
 0x15e   : > { %v2177_v46 = vpop.f32.mrf.mxu0  ;;  %v2183_v47 = vpop.f32.mrf.mxu1 }
 0x15f   : > { %1527 = vst.msk [vmem:[#allocation2 + $0x8] sm:$0xff] %vm205_vm2, %v1518_v45 }
 0x160   : > { %v1643_v48 = vpop.f32.mrf.mxu0  ;;  %v1487_v50 = vpop.f32.mrf.mxu1  ;;  %v1349_v25 = vld [vmem:[#allocation2 + $0x38] sm:$0xff] }
 0x161   : > { %v1519_v51 = vadd.f32 %v1487_v50, %v1344_v49 }
 0x162   : > { %v2204_v52 = vpop.f32.mrf.mxu0  ;;  %v1535_v53 = vld [vmem:[#allocation2] sm:$0xff]  ;;  %v2186_v54 = vpop.f32.mrf.mxu1 }
 0x163   : > { %1528 = vst.msk [vmem:[#allocation2 + $0x10] sm:$0xff] %vm205_vm2, %v1519_v51  ;;  %v1681_v55 = vadd.f32 %v1643_v48, %v1535_v53 }
 0x164   : > { %v1646_v22 = vpop.f32.mrf.mxu0  ;;  %v1490_v36 = vpop.f32.mrf.mxu1  ;;  %v1350_v46 = vld [vmem:[#allocation2 + $0x40] sm:$0xff] }
 0x165   : > { %1690 = vst.msk [vmem:[#allocation2] sm:$0xff] %vm205_vm2, %v1681_v55  ;;  %v1520_v37 = vadd.f32 %v1490_v36, %v1345_v1 }
 0x166   : > { %v2205_v40 = vpop.f32.mrf.mxu0  ;;  %v1536_v56 = vld [vmem:[#allocation2 + $0x8] sm:$0xff]  ;;  %v2187_v57 = vpop.f32.mrf.mxu1 }
 0x167   : > { %1529 = vst.msk [vmem:[#allocation2 + $0x18] sm:$0xff] %vm205_vm2, %v1520_v37  ;;  %v1682_v58 = vadd.f32 %v1646_v22, %v1536_v56 }
 0x168   : > { %v1651_v59 = vpop.f32.mrf.mxu0  ;;  %v1495_v61 = vpop.f32.mrf.mxu1 }
 0x169   : > { %1691 = vst.msk [vmem:[#allocation2 + $0x8] sm:$0xff] %vm205_vm2, %v1682_v58  ;;  %v1521_v62 = vadd.f32 %v1495_v61, %v1346_v60 }
 0x16a   : > { %v2208_v63 = vpop.f32.mrf.mxu0  ;;  %v1537_v2 = vld [vmem:[#allocation2 + $0x10] sm:$0xff]  ;;  %v2190_v3 = vpop.f32.mrf.mxu1 }
 0x16b   : > { %1530 = vst.msk [vmem:[#allocation2 + $0x20] sm:$0xff] %vm205_vm2, %v1521_v62  ;;  %v1683_v4 = vadd.f32 %v1651_v59, %v1537_v2 }
 0x16c   : > { %v1654_v31 = vpop.f32.mrf.mxu0  ;;  %v1699_v7 = vld [vmem:[#allocation2] sm:$0xff]  ;;  %v1498_v9 = vpop.f32.mrf.mxu1 }
 0x16d   : > { %v1715_v10 = vadd.f32 %v2721_v0, %v1699_v7  ;;  %1692 = vst.msk [vmem:[#allocation2 + $0x10] sm:$0xff] %vm205_vm2, %v1683_v4  ;;  %v1522_v12 = vadd.f32 %v1498_v9, %v1347_v8 }
 0x16e   : > { %v2209_v14 = vpop.f32.mrf.mxu0  ;;  %v1538_v15 = vld [vmem:[#allocation2 + $0x18] sm:$0xff]  ;;  %v2191_v16 = vpop.f32.mrf.mxu1 }
 0x16f   : > { %vm1724_vm5 = vcmp.gt.f32.partialorder %v1715_v10, 0.0  ;;  %v1733_v17 = vmul.f32 0.01, %v1715_v10  ;;  %1531 = vst.msk [vmem:[#allocation2 + $0x28] sm:$0xff] %vm205_vm2, %v1522_v12  ;;  %v1684_v18 = vadd.f32 %v1654_v31, %v1538_v15 }
 0x170   : > { %v1659_v20 = vpop.f32.mrf.mxu0  ;;  %v1700_v21 = vld [vmem:[#allocation2 + $0x8] sm:$0xff]  ;;  %v1503_v24 = vpop.f32.mrf.mxu1 }
 0x171   : > { %v1742_v26 = vsel %vm1724_vm5, %v1715_v10, %v1733_v17  ;;  %v1716_v27 = vadd.f32 %v2721_v0, %v1700_v21  ;;  %1693 = vst.msk [vmem:[#allocation2 + $0x18] sm:$0xff] %vm205_vm2, %v1684_v18  ;;  %v1523_v30 = vadd.f32 %v1503_v24, %v1348_v23 }
 0x172   : > { %v2212_v32 = vpop.f32.mrf.mxu0  ;;  %1751 = vst.msk [vmem:[%s2730_s16] sm:$0xff] %vm205_vm2, %v1742_v26  ;;  %v1539_v5 = vld [vmem:[#allocation2 + $0x20] sm:$0xff]  ;;  %v2194_v6 = vpop.f32.mrf.mxu1 }
 0x173   : > { %vm1725_vm6 = vcmp.gt.f32.partialorder %v1716_v27, 0.0  ;;  %v1734_v13 = vmul.f32 0.01, %v1716_v27  ;;  %1532 = vst.msk [vmem:[#allocation2 + $0x30] sm:$0xff] %vm205_vm2, %v1523_v30  ;;  %v1685_v11 = vadd.f32 %v1659_v20, %v1539_v5 }
 0x174   : > { %v1662_v19 = vpop.f32.mrf.mxu0  ;;  %v1701_v28 = vld [vmem:[#allocation2 + $0x10] sm:$0xff]  ;;  %v1506_v29 = vpop.f32.mrf.mxu1 }
 0x175   : > { %v1743_v33 = vsel %vm1725_vm6, %v1716_v27, %v1734_v13  ;;  %v1717_v34 = vadd.f32 %v2721_v0, %v1701_v28  ;;  %1694 = vst.msk [vmem:[#allocation2 + $0x20] sm:$0xff] %vm205_vm2, %v1685_v11  ;;  %v1524_v35 = vadd.f32 %v1506_v29, %v1349_v25 }
 0x176   : > { %v2213_v38 = vpop.f32.mrf.mxu0  ;;  %1752 = vst.msk [vmem:[%s2730_s16 + $0x8] sm:$0xff] %vm205_vm2, %v1743_v33  ;;  %v1540_v39 = vld [vmem:[#allocation2 + $0x28] sm:$0xff]  ;;  %v2195_v41 = vpop.f32.mrf.mxu1 }
 0x177   : > { %vm1726_vm7 = vcmp.gt.f32.partialorder %v1717_v34, 0.0  ;;  %v1735_v42 = vmul.f32 0.01, %v1717_v34  ;;  %1533 = vst.msk [vmem:[#allocation2 + $0x38] sm:$0xff] %vm205_vm2, %v1524_v35  ;;  %v1686_v43 = vadd.f32 %v1662_v19, %v1540_v39 }
 0x178   : > { %v1667_v44 = vpop.f32.mrf.mxu0  ;;  %v1702_v45 = vld [vmem:[#allocation2 + $0x18] sm:$0xff]  ;;  %v1511_v47 = vpop.f32.mrf.mxu1 }
 0x179   : > { %v1744_v48 = vsel %vm1726_vm7, %v1717_v34, %v1735_v42  ;;  %v1718_v49 = vadd.f32 %v2721_v0, %v1702_v45  ;;  %1695 = vst.msk [vmem:[#allocation2 + $0x28] sm:$0xff] %vm205_vm2, %v1686_v43  ;;  %v1525_v50 = vadd.f32 %v1511_v47, %v1350_v46 }
 0x17a   : > { %v2216_v51 = vpop.f32.mrf.mxu0  ;;  %1753 = vst.msk [vmem:[%s2730_s16 + $0x10] sm:$0xff] %vm205_vm2, %v1744_v48  ;;  %v1541_v52 = vld [vmem:[#allocation2 + $0x30] sm:$0xff]  ;;  %v2198_v53 = vpop.f32.mrf.mxu1 }
 0x17b   : > { %vm1727_vm8 = vcmp.gt.f32.partialorder %v1718_v49, 0.0  ;;  %v1736_v54 = vmul.f32 0.01, %v1718_v49  ;;  %1534 = vst.msk [vmem:[#allocation2 + $0x40] sm:$0xff] %vm205_vm2, %v1525_v50  ;;  %v1687_v55 = vadd.f32 %v1667_v44, %v1541_v52 }
 0x17c   : > { %v1670_v22 = vpop.f32.mrf.mxu0  ;;  %v1703_v1 = vld [vmem:[#allocation2 + $0x20] sm:$0xff]  ;;  %v1514_v36 = vpop.f32.mrf.mxu1 }
 0x17d   : > { %v1745_v37 = vsel %vm1727_vm8, %v1718_v49, %v1736_v54  ;;  %v1719_v40 = vadd.f32 %v2721_v0, %v1703_v1  ;;  %1696 = vst.msk [vmem:[#allocation2 + $0x30] sm:$0xff] %vm205_vm2, %v1687_v55 }
 0x17e   : > { %v2217_v56 = vpop.f32.mrf.mxu0  ;;  %1754 = vst.msk [vmem:[%s2730_s16 + $0x18] sm:$0xff] %vm205_vm2, %v1745_v37  ;;  %v1542_v57 = vld [vmem:[#allocation2 + $0x38] sm:$0xff]  ;;  %v2199_v58 = vpop.f32.mrf.mxu1 }
 0x17f   : > { %vm1728_vm9 = vcmp.gt.f32.partialorder %v1719_v40, 0.0  ;;  %v1737_v59 = vmul.f32 0.01, %v1719_v40  ;;  %v1688_v60 = vadd.f32 %v1670_v22, %v1542_v57 }
 0x180   : > { %v1675_v61 = vpop.f32.mrf.mxu0  ;;  %v1704_v62 = vld [vmem:[#allocation2 + $0x28] sm:$0xff] }
 0x181   : > { %v1746_v63 = vsel %vm1728_vm9, %v1719_v40, %v1737_v59  ;;  %v1720_v2 = vadd.f32 %v2721_v0, %v1704_v62  ;;  %1697 = vst.msk [vmem:[#allocation2 + $0x38] sm:$0xff] %vm205_vm2, %v1688_v60 }
 0x182   : > { %v2220_v3 = vpop.f32.mrf.mxu0  ;;  %1755 = vst.msk [vmem:[%s2730_s16 + $0x20] sm:$0xff] %vm205_vm2, %v1746_v63  ;;  %v1543_v4 = vld [vmem:[#allocation2 + $0x40] sm:$0xff] }
 0x183   : > { %vm1729_vm10 = vcmp.gt.f32.partialorder %v1720_v2, 0.0  ;;  %v1738_v31 = vmul.f32 0.01, %v1720_v2  ;;  %v1689_v7 = vadd.f32 %v1675_v61, %v1543_v4 }
 0x184   : > { %v1678_v8 = vpop.f32.mrf.mxu0  ;;  %v1705_v9 = vld [vmem:[#allocation2 + $0x30] sm:$0xff] }
 0x185   : > { %v1747_v10 = vsel %vm1729_vm10, %v1720_v2, %v1738_v31  ;;  %v1721_v12 = vadd.f32 %v2721_v0, %v1705_v9  ;;  %1698 = vst.msk [vmem:[#allocation2 + $0x40] sm:$0xff] %vm205_vm2, %v1689_v7 }
 0x186   : > { %v2221_v14 = vpop.f32.mrf.mxu0  ;;  %1756 = vst.msk [vmem:[%s2730_s16 + $0x28] sm:$0xff] %vm205_vm2, %v1747_v10 }
 0x187   : > { %vm1730_vm11 = vcmp.gt.f32.partialorder %v1721_v12, 0.0  ;;  %v1739_v15 = vmul.f32 0.01, %v1721_v12 }
 0x188   : > { %v1706_v16 = vld [vmem:[#allocation2 + $0x38] sm:$0xff] }
 0x189   : > { %v1748_v17 = vsel %vm1730_vm11, %v1721_v12, %v1739_v15  ;;  %v1722_v18 = vadd.f32 %v2721_v0, %v1706_v16 }
 0x18a   : > { %1757 = vst.msk [vmem:[%s2730_s16 + $0x30] sm:$0xff] %vm205_vm2, %v1748_v17 }
 0x18b   : > { %vm1731_vm12 = vcmp.gt.f32.partialorder %v1722_v18, 0.0  ;;  %v1740_v20 = vmul.f32 0.01, %v1722_v18 }
 0x18c   : > { %v1707_v21 = vld [vmem:[#allocation2 + $0x40] sm:$0xff] }
 0x18d   : > { %v1749_v23 = vsel %vm1731_vm12, %v1722_v18, %v1740_v20  ;;  %v1723_v24 = vadd.f32 %v2721_v0, %v1707_v21 }
 0x18e   : > { %1758 = vst.msk [vmem:[%s2730_s16 + $0x38] sm:$0xff] %vm205_vm2, %v1749_v23 }
 0x18f   : > { %vm1732_vm13 = vcmp.gt.f32.partialorder %v1723_v24, 0.0  ;;  %v1741_v26 = vmul.f32 0.01, %v1723_v24 }
 0x191   : > { %v1750_v27 = vsel %vm1732_vm13, %v1723_v24, %v1741_v26 }
 0x192   : > { %1759 = vst.msk [vmem:[%s2730_s16 + $0x40] sm:$0xff] %vm205_vm2, %v1750_v27 }
 0x193 PF: > { %s13_s12 = sadd.s32 1, %s2287_s12  }
 0x194   : > { %p10_p4 = scmp.ge.s32.totalorder %s13_s12, 4  }
 0x196   :  { %12 = sbr.rel (!%p10_p4) target bundleno = 1 (0x1), region = 73 }

</bundles_post_ra>
